<compile_context>
chip_gen: v5e
topology: v5e:2x2
jax: 0.10.0
libtpu: 0.0.40
codegen_flags: <defaults>
</compile_context>

<pallas_src>
import functools

import jax
import jax.numpy as jnp
from jax import lax
from jax.experimental import pallas as pl
from jax.experimental.pallas import tpu as pltpu

EPS = 1e-5
_TAPS = tuple((dh, dw) for dh in (-1, 0, 1) for dw in (-1, 0, 1))  # tap order


def _make_tap_masks(H, W, P):
    """Per-tap validity masks over the flattened (n, h, w) spatial axis.

    Built once per kernel invocation and reused by both convolutions
    (review item: iota/compare work is not CSE'd by JAX).
    """
    lane = lax.broadcasted_iota(jnp.int32, (1, P), 1)
    w_shift = (W - 1).bit_length()          # H, W are powers of two (asserted)
    w_i = lane & (W - 1)
    h_i = (lane >> w_shift) & (H - 1)
    masks = []
    for dh, dw in _TAPS:
        if dh == 0 and dw == 0:
            masks.append(None)              # center tap: always valid
        else:
            hh = h_i + dh
            ww = w_i + dw
            masks.append((hh >= 0) & (hh < H) & (ww >= 0) & (ww < W))
    return masks


def _im2col(x_cm, masks, W):
    """x_cm (C, P) -> (9*C, P) patches for a 3x3 'same' conv, channels-major.

    Each tap is a roll of the flattened spatial axis; the border masks zero
    both the implicit zero-padding positions and any wrapped / cross-image
    elements (they coincide exactly), so circular shift is correct.
    """
    pieces = []
    for (dh, dw), m in zip(_TAPS, masks):
        d = dh * W + dw
        win = x_cm if d == 0 else jnp.roll(x_cm, -d, axis=1)
        if m is not None:
            win = jnp.where(m, win, 0.0)
        pieces.append(win)
    return jnp.concatenate(pieces, axis=0)  # row = tap*C + c


def _bn_train(acc, gamma, beta, inv_n):
    """Training-mode BatchNorm with single-pass batch stats (biased var)."""
    s = jnp.sum(acc, axis=1, keepdims=True)
    ss = jnp.sum(acc * acc, axis=1, keepdims=True)
    mean = s * inv_n
    var = jnp.maximum(ss * inv_n - mean * mean, 0.0)   # clamp (review concern)
    scale = gamma * lax.rsqrt(var + EPS)
    shift = beta - mean * scale
    return acc * scale + shift


def resblock_kernel(x_ref, w1s_ref, g1_ref, be1_ref, w2_ref, g2_ref, be2_ref,
                    bm_ref, out_ref, *, H, W, Cout):
    P = x_ref.shape[1]
    inv_n = 1.0 / float(P)
    masks = _make_tap_masks(H, W, P)        # hoisted: shared by both convs

    x = x_ref[...]                          # (Cin_p, P) f32, lane-dense

    # conv1 AND the 1x1 match_dimensions skip in ONE im2col matmul.
    p1 = _im2col(x, masks, W)                                    # (9*Cin_p, P)
    big = jnp.dot(w1s_ref[...], p1,
                  preferred_element_type=jnp.float32)            # (2*Cout, P)
    a1 = big[:Cout, :]                                           # conv1 pre-act
    ident = big[Cout:, :] + bm_ref[...]                          # 1x1 skip

    # conv1 bias is cancelled by BN's mean subtraction -> folded away.
    y1 = jnp.maximum(_bn_train(a1, g1_ref[...], be1_ref[...], inv_n), 0.0)

    # conv2 -> BN2 (y1 never leaves VMEM/vregs: fully fused)
    p2 = _im2col(y1, masks, W)                                   # (9*Cout, P)
    a2 = jnp.dot(w2_ref[...], p2, preferred_element_type=jnp.float32)
    z2 = _bn_train(a2, g2_ref[...], be2_ref[...], inv_n)

    # lane-dense full-ref store (P lanes, no masked vst)
    out_ref[...] = jnp.maximum(z2 + ident, 0.0).astype(out_ref.dtype)


def resblock_forward(x_nchw, params):
    """x_nchw: (N, Cin, H, W) f32 -> (N, Cout, H, W) f32 (ResBlock forward)."""
    w1, b1, g1, be1, w2, b2, g2, be2, wm, bm = params
    del b1, b2  # bias immediately before training-mode BN is a mathematical no-op
    N, Cin, H, W = x_nchw.shape
    Cout = w1.shape[-1]
    P = N * H * W
    assert H & (H - 1) == 0 and W & (W - 1) == 0, "kernel assumes pow2 H, W"
    assert Cout % 8 == 0, "kernel assumes Cout multiple of 8"
    Cin_p = -(-Cin // 8) * 8                      # pad Cin to sublane tile

    # channels-major, flat-spatial input: x_cm[c, n*H*W + h*W + w]
    x_cm = jnp.transpose(x_nchw, (1, 0, 2, 3)).reshape(Cin, P)
    x_cm = jnp.pad(x_cm, ((0, Cin_p - Cin), (0, 0)))

    # conv1 weight (3,3,Cin,Cout) -> (Cout, 9*Cin_p), column = tap*Cin_p + c
    w1_cm = jnp.pad(w1, ((0, 0), (0, 0), (0, Cin_p - Cin), (0, 0)))
    w1_cm = w1_cm.reshape(9 * Cin_p, Cout).T
    # 1x1 skip folded under conv1: wm lives in the center-tap (tap=4) columns.
    wm_cm = jnp.zeros((Cout, 9 * Cin_p), jnp.float32)
    wm_cm = wm_cm.at[:, 4 * Cin_p:4 * Cin_p + Cin].set(wm)
    w1s = jnp.concatenate([w1_cm, wm_cm], axis=0)            # (2*Cout, 9*Cin_p)

    w2_cm = w2.reshape(9 * Cout, Cout).T                     # (Cout, 9*Cout)
    col = lambda v: v.reshape(-1, 1).astype(jnp.float32)     # per-channel params

    kernel = functools.partial(resblock_kernel, H=H, W=W, Cout=Cout)
    vmem = pl.BlockSpec(memory_space=pltpu.MemorySpace.VMEM)

    # VMEM limit derived from the actual resident buffers (review item):
    # inputs + output + both im2col temporaries, with generous headroom,
    # floored at 4 MiB and capped at v7x-safe 64 MiB.
    patch_elems = 9 * max(Cin_p, Cout) * P
    vmem_bytes = 4 * (x_cm.size + w1s.size + w2_cm.size + 2 * Cout * P
                      + 2 * patch_elems)
    vmem_limit = int(min(64 << 20, max(4 << 20, 8 * vmem_bytes)))

    out_cm = pl.pallas_call(
        kernel,
        out_shape=jax.ShapeDtypeStruct((Cout, P), jnp.float32),
        in_specs=[vmem] * 8,
        out_specs=vmem,
        compiler_params=pltpu.CompilerParams(vmem_limit_bytes=vmem_limit),
    )(x_cm, w1s, col(g1), col(be1), w2_cm, col(g2), col(be2), col(bm))

    return jnp.transpose(out_cm.reshape(Cout, N, H, W), (1, 0, 2, 3))


def reference_forward(x_nchw, params):
    """Plain-JAX f32 reference (matches kernel precision)."""
    w1, b1, g1, be1, w2, b2, g2, be2, wm, bm = params
    x = jnp.transpose(x_nchw, (0, 2, 3, 1))                  # NHWC

    def conv3(v, w, b):
        out = lax.conv_general_dilated(
            v, w, (1, 1), 'SAME',
            dimension_numbers=('NHWC', 'HWIO', 'NHWC'),
            preferred_element_type=jnp.float32)
        return out + b.reshape(1, 1, 1, -1)

    def bn(z, g, be):
        mean = jnp.mean(z, axis=(0, 1, 2), keepdims=True)
        var = jnp.mean((z - mean) ** 2, axis=(0, 1, 2), keepdims=True)
        return (z - mean) * lax.rsqrt(var + EPS) * g.reshape(1, 1, 1, -1) \
            + be.reshape(1, 1, 1, -1)

    y = jnp.maximum(bn(conv3(x, w1, b1), g1, be1), 0.0)
    z = bn(conv3(y, w2, b2), g2, be2)
    ident = jnp.einsum('nhwc,oc->nhwo', x, wm,
                       preferred_element_type=jnp.float32) + bm.reshape(1, 1, 1, -1)
    out = jnp.maximum(z + ident, 0.0)
    return jnp.transpose(out, (0, 3, 1, 2))


def init_params(key, cin, cout):
    ks = jax.random.split(key, 10)
    w1 = jax.random.normal(ks[0], (3, 3, cin, cout), jnp.float32) * 0.2
    b1 = jax.random.normal(ks[1], (cout,), jnp.float32) * 0.1
    g1 = 1.0 + 0.1 * jax.random.normal(ks[2], (cout,), jnp.float32)
    be1 = 0.1 * jax.random.normal(ks[3], (cout,), jnp.float32)
    w2 = jax.random.normal(ks[4], (3, 3, cout, cout), jnp.float32) * 0.2
    b2 = jax.random.normal(ks[5], (cout,), jnp.float32) * 0.1
    g2 = 1.0 + 0.1 * jax.random.normal(ks[6], (cout,), jnp.float32)
    be2 = 0.1 * jax.random.normal(ks[7], (cout,), jnp.float32)
    wm = jax.random.normal(ks[8], (cout, cin), jnp.float32) * 0.2   # 1x1 conv
    bm = jax.random.normal(ks[9], (cout,), jnp.float32) * 0.1
    return (w1, b1, g1, be1, w2, b2, g2, be2, wm, bm)


if __name__ == "__main__":
    key = jax.random.PRNGKey(0)
    k_x, k_p = jax.random.split(key)

    N, Cin, Cout, H, W = 2, 4, 8, 16, 16
    x = jax.random.normal(k_x, (N, Cin, H, W), jnp.float32)
    params = init_params(k_p, Cin, Cout)

    out = jax.jit(resblock_forward)(x, params)
    out = jax.block_until_ready(out)

    ref = reference_forward(x, params)
    assert out.shape == (N, Cout, H, W)
    err = float(jnp.max(jnp.abs(out - ref)))
    assert jnp.allclose(out, ref, atol=1e-2, rtol=1e-2), f"max abs err {err}"

    print("KERNEL_OK")
</pallas_src>

<mosaic_0001>
module attributes {stable_mosaic.version = 11 : i64} {
  func.func @resblock_kernel(%arg0: memref<8x512xf32, #tpu.memory_space<vmem>>, %arg1: memref<16x72xf32, #tpu.memory_space<vmem>>, %arg2: memref<8x1xf32, #tpu.memory_space<vmem>>, %arg3: memref<8x1xf32, #tpu.memory_space<vmem>>, %arg4: memref<8x72xf32, #tpu.memory_space<vmem>>, %arg5: memref<8x1xf32, #tpu.memory_space<vmem>>, %arg6: memref<8x1xf32, #tpu.memory_space<vmem>>, %arg7: memref<8x1xf32, #tpu.memory_space<vmem>>, %arg8: memref<8x512xf32, #tpu.memory_space<vmem>>) attributes {dimension_semantics = [], scalar_prefetch = 0 : i64, scratch_operands = 0 : i64, tpu.core_type = #tpu.core_type<tc>} {
    %0 = tpu.iota {dimensions = array<i32: 1>} : vector<1x512xi32>
    %c15_i32 = arith.constant 15 : i32
    %1 = vector.broadcast %c15_i32 : i32 to vector<1x512xi32>
    %2 = arith.andi %0, %1 : vector<1x512xi32>
    %c4_i32 = arith.constant 4 : i32
    %3 = vector.broadcast %c4_i32 : i32 to vector<1x512xi32>
    %4 = arith.shrsi %0, %3 : vector<1x512xi32>
    %c15_i32_0 = arith.constant 15 : i32
    %5 = vector.broadcast %c15_i32_0 : i32 to vector<1x512xi32>
    %6 = arith.andi %4, %5 : vector<1x512xi32>
    %c-1_i32 = arith.constant -1 : i32
    %7 = vector.broadcast %c-1_i32 : i32 to vector<1x512xi32>
    %8 = arith.addi %6, %7 : vector<1x512xi32>
    %c-1_i32_1 = arith.constant -1 : i32
    %9 = vector.broadcast %c-1_i32_1 : i32 to vector<1x512xi32>
    %10 = arith.addi %2, %9 : vector<1x512xi32>
    %c0_i32 = arith.constant 0 : i32
    %11 = vector.broadcast %c0_i32 : i32 to vector<1x512xi32>
    %12 = arith.cmpi sge, %8, %11 : vector<1x512xi32>
    %c16_i32 = arith.constant 16 : i32
    %13 = vector.broadcast %c16_i32 : i32 to vector<1x512xi32>
    %14 = arith.cmpi slt, %8, %13 : vector<1x512xi32>
    %15 = arith.andi %12, %14 : vector<1x512xi1>
    %c0_i32_2 = arith.constant 0 : i32
    %16 = vector.broadcast %c0_i32_2 : i32 to vector<1x512xi32>
    %17 = arith.cmpi sge, %10, %16 : vector<1x512xi32>
    %18 = arith.andi %15, %17 : vector<1x512xi1>
    %c16_i32_3 = arith.constant 16 : i32
    %19 = vector.broadcast %c16_i32_3 : i32 to vector<1x512xi32>
    %20 = arith.cmpi slt, %10, %19 : vector<1x512xi32>
    %21 = arith.andi %18, %20 : vector<1x512xi1>
    %c-1_i32_4 = arith.constant -1 : i32
    %22 = vector.broadcast %c-1_i32_4 : i32 to vector<1x512xi32>
    %23 = arith.addi %6, %22 : vector<1x512xi32>
    %c0_i32_5 = arith.constant 0 : i32
    %24 = vector.broadcast %c0_i32_5 : i32 to vector<1x512xi32>
    %25 = arith.addi %2, %24 : vector<1x512xi32>
    %c0_i32_6 = arith.constant 0 : i32
    %26 = vector.broadcast %c0_i32_6 : i32 to vector<1x512xi32>
    %27 = arith.cmpi sge, %23, %26 : vector<1x512xi32>
    %c16_i32_7 = arith.constant 16 : i32
    %28 = vector.broadcast %c16_i32_7 : i32 to vector<1x512xi32>
    %29 = arith.cmpi slt, %23, %28 : vector<1x512xi32>
    %30 = arith.andi %27, %29 : vector<1x512xi1>
    %c0_i32_8 = arith.constant 0 : i32
    %31 = vector.broadcast %c0_i32_8 : i32 to vector<1x512xi32>
    %32 = arith.cmpi sge, %25, %31 : vector<1x512xi32>
    %33 = arith.andi %30, %32 : vector<1x512xi1>
    %c16_i32_9 = arith.constant 16 : i32
    %34 = vector.broadcast %c16_i32_9 : i32 to vector<1x512xi32>
    %35 = arith.cmpi slt, %25, %34 : vector<1x512xi32>
    %36 = arith.andi %33, %35 : vector<1x512xi1>
    %c-1_i32_10 = arith.constant -1 : i32
    %37 = vector.broadcast %c-1_i32_10 : i32 to vector<1x512xi32>
    %38 = arith.addi %6, %37 : vector<1x512xi32>
    %c1_i32 = arith.constant 1 : i32
    %39 = vector.broadcast %c1_i32 : i32 to vector<1x512xi32>
    %40 = arith.addi %2, %39 : vector<1x512xi32>
    %c0_i32_11 = arith.constant 0 : i32
    %41 = vector.broadcast %c0_i32_11 : i32 to vector<1x512xi32>
    %42 = arith.cmpi sge, %38, %41 : vector<1x512xi32>
    %c16_i32_12 = arith.constant 16 : i32
    %43 = vector.broadcast %c16_i32_12 : i32 to vector<1x512xi32>
    %44 = arith.cmpi slt, %38, %43 : vector<1x512xi32>
    %45 = arith.andi %42, %44 : vector<1x512xi1>
    %c0_i32_13 = arith.constant 0 : i32
    %46 = vector.broadcast %c0_i32_13 : i32 to vector<1x512xi32>
    %47 = arith.cmpi sge, %40, %46 : vector<1x512xi32>
    %48 = arith.andi %45, %47 : vector<1x512xi1>
    %c16_i32_14 = arith.constant 16 : i32
    %49 = vector.broadcast %c16_i32_14 : i32 to vector<1x512xi32>
    %50 = arith.cmpi slt, %40, %49 : vector<1x512xi32>
    %51 = arith.andi %48, %50 : vector<1x512xi1>
    %c0_i32_15 = arith.constant 0 : i32
    %52 = vector.broadcast %c0_i32_15 : i32 to vector<1x512xi32>
    %53 = arith.addi %6, %52 : vector<1x512xi32>
    %c-1_i32_16 = arith.constant -1 : i32
    %54 = vector.broadcast %c-1_i32_16 : i32 to vector<1x512xi32>
    %55 = arith.addi %2, %54 : vector<1x512xi32>
    %c0_i32_17 = arith.constant 0 : i32
    %56 = vector.broadcast %c0_i32_17 : i32 to vector<1x512xi32>
    %57 = arith.cmpi sge, %53, %56 : vector<1x512xi32>
    %c16_i32_18 = arith.constant 16 : i32
    %58 = vector.broadcast %c16_i32_18 : i32 to vector<1x512xi32>
    %59 = arith.cmpi slt, %53, %58 : vector<1x512xi32>
    %60 = arith.andi %57, %59 : vector<1x512xi1>
    %c0_i32_19 = arith.constant 0 : i32
    %61 = vector.broadcast %c0_i32_19 : i32 to vector<1x512xi32>
    %62 = arith.cmpi sge, %55, %61 : vector<1x512xi32>
    %63 = arith.andi %60, %62 : vector<1x512xi1>
    %c16_i32_20 = arith.constant 16 : i32
    %64 = vector.broadcast %c16_i32_20 : i32 to vector<1x512xi32>
    %65 = arith.cmpi slt, %55, %64 : vector<1x512xi32>
    %66 = arith.andi %63, %65 : vector<1x512xi1>
    %c0_i32_21 = arith.constant 0 : i32
    %67 = vector.broadcast %c0_i32_21 : i32 to vector<1x512xi32>
    %68 = arith.addi %6, %67 : vector<1x512xi32>
    %c1_i32_22 = arith.constant 1 : i32
    %69 = vector.broadcast %c1_i32_22 : i32 to vector<1x512xi32>
    %70 = arith.addi %2, %69 : vector<1x512xi32>
    %c0_i32_23 = arith.constant 0 : i32
    %71 = vector.broadcast %c0_i32_23 : i32 to vector<1x512xi32>
    %72 = arith.cmpi sge, %68, %71 : vector<1x512xi32>
    %c16_i32_24 = arith.constant 16 : i32
    %73 = vector.broadcast %c16_i32_24 : i32 to vector<1x512xi32>
    %74 = arith.cmpi slt, %68, %73 : vector<1x512xi32>
    %75 = arith.andi %72, %74 : vector<1x512xi1>
    %c0_i32_25 = arith.constant 0 : i32
    %76 = vector.broadcast %c0_i32_25 : i32 to vector<1x512xi32>
    %77 = arith.cmpi sge, %70, %76 : vector<1x512xi32>
    %78 = arith.andi %75, %77 : vector<1x512xi1>
    %c16_i32_26 = arith.constant 16 : i32
    %79 = vector.broadcast %c16_i32_26 : i32 to vector<1x512xi32>
    %80 = arith.cmpi slt, %70, %79 : vector<1x512xi32>
    %81 = arith.andi %78, %80 : vector<1x512xi1>
    %c1_i32_27 = arith.constant 1 : i32
    %82 = vector.broadcast %c1_i32_27 : i32 to vector<1x512xi32>
    %83 = arith.addi %6, %82 : vector<1x512xi32>
    %c-1_i32_28 = arith.constant -1 : i32
    %84 = vector.broadcast %c-1_i32_28 : i32 to vector<1x512xi32>
    %85 = arith.addi %2, %84 : vector<1x512xi32>
    %c0_i32_29 = arith.constant 0 : i32
    %86 = vector.broadcast %c0_i32_29 : i32 to vector<1x512xi32>
    %87 = arith.cmpi sge, %83, %86 : vector<1x512xi32>
    %c16_i32_30 = arith.constant 16 : i32
    %88 = vector.broadcast %c16_i32_30 : i32 to vector<1x512xi32>
    %89 = arith.cmpi slt, %83, %88 : vector<1x512xi32>
    %90 = arith.andi %87, %89 : vector<1x512xi1>
    %c0_i32_31 = arith.constant 0 : i32
    %91 = vector.broadcast %c0_i32_31 : i32 to vector<1x512xi32>
    %92 = arith.cmpi sge, %85, %91 : vector<1x512xi32>
    %93 = arith.andi %90, %92 : vector<1x512xi1>
    %c16_i32_32 = arith.constant 16 : i32
    %94 = vector.broadcast %c16_i32_32 : i32 to vector<1x512xi32>
    %95 = arith.cmpi slt, %85, %94 : vector<1x512xi32>
    %96 = arith.andi %93, %95 : vector<1x512xi1>
    %c1_i32_33 = arith.constant 1 : i32
    %97 = vector.broadcast %c1_i32_33 : i32 to vector<1x512xi32>
    %98 = arith.addi %6, %97 : vector<1x512xi32>
    %c0_i32_34 = arith.constant 0 : i32
    %99 = vector.broadcast %c0_i32_34 : i32 to vector<1x512xi32>
    %100 = arith.addi %2, %99 : vector<1x512xi32>
    %c0_i32_35 = arith.constant 0 : i32
    %101 = vector.broadcast %c0_i32_35 : i32 to vector<1x512xi32>
    %102 = arith.cmpi sge, %98, %101 : vector<1x512xi32>
    %c16_i32_36 = arith.constant 16 : i32
    %103 = vector.broadcast %c16_i32_36 : i32 to vector<1x512xi32>
    %104 = arith.cmpi slt, %98, %103 : vector<1x512xi32>
    %105 = arith.andi %102, %104 : vector<1x512xi1>
    %c0_i32_37 = arith.constant 0 : i32
    %106 = vector.broadcast %c0_i32_37 : i32 to vector<1x512xi32>
    %107 = arith.cmpi sge, %100, %106 : vector<1x512xi32>
    %108 = arith.andi %105, %107 : vector<1x512xi1>
    %c16_i32_38 = arith.constant 16 : i32
    %109 = vector.broadcast %c16_i32_38 : i32 to vector<1x512xi32>
    %110 = arith.cmpi slt, %100, %109 : vector<1x512xi32>
    %111 = arith.andi %108, %110 : vector<1x512xi1>
    %c1_i32_39 = arith.constant 1 : i32
    %112 = vector.broadcast %c1_i32_39 : i32 to vector<1x512xi32>
    %113 = arith.addi %6, %112 : vector<1x512xi32>
    %c1_i32_40 = arith.constant 1 : i32
    %114 = vector.broadcast %c1_i32_40 : i32 to vector<1x512xi32>
    %115 = arith.addi %2, %114 : vector<1x512xi32>
    %c0_i32_41 = arith.constant 0 : i32
    %116 = vector.broadcast %c0_i32_41 : i32 to vector<1x512xi32>
    %117 = arith.cmpi sge, %113, %116 : vector<1x512xi32>
    %c16_i32_42 = arith.constant 16 : i32
    %118 = vector.broadcast %c16_i32_42 : i32 to vector<1x512xi32>
    %119 = arith.cmpi slt, %113, %118 : vector<1x512xi32>
    %120 = arith.andi %117, %119 : vector<1x512xi1>
    %c0_i32_43 = arith.constant 0 : i32
    %121 = vector.broadcast %c0_i32_43 : i32 to vector<1x512xi32>
    %122 = arith.cmpi sge, %115, %121 : vector<1x512xi32>
    %123 = arith.andi %120, %122 : vector<1x512xi1>
    %c16_i32_44 = arith.constant 16 : i32
    %124 = vector.broadcast %c16_i32_44 : i32 to vector<1x512xi32>
    %125 = arith.cmpi slt, %115, %124 : vector<1x512xi32>
    %126 = arith.andi %123, %125 : vector<1x512xi1>
    %c0 = arith.constant 0 : index
    %c0_45 = arith.constant 0 : index
    %127 = vector.load %arg0[%c0, %c0_45] : memref<8x512xf32, #tpu.memory_space<vmem>>, vector<8x512xf32>
    %128 = vector.extract_strided_slice %127 {offsets = [0, 495], sizes = [8, 17], strides = [1, 1]} : vector<8x512xf32> to vector<8x17xf32>
    %129 = vector.extract_strided_slice %127 {offsets = [0, 0], sizes = [8, 495], strides = [1, 1]} : vector<8x512xf32> to vector<8x495xf32>
    %130 = tpu.concatenate %128, %129 in 1 : vector<8x17xf32>, vector<8x495xf32> -> vector<8x512xf32>
    %cst = arith.constant 0.000000e+00 : f32
    %131 = vector.shape_cast %21 : vector<1x512xi1> to vector<1x512xi1>
    %132 = vector.broadcast %131 : vector<1x512xi1> to vector<8x512xi1>
    %133 = vector.broadcast %cst : f32 to vector<8x512xf32>
    %134 = arith.select %132, %130, %133 : vector<8x512xi1>, vector<8x512xf32>
    %135 = vector.extract_strided_slice %127 {offsets = [0, 496], sizes = [8, 16], strides = [1, 1]} : vector<8x512xf32> to vector<8x16xf32>
    %136 = vector.extract_strided_slice %127 {offsets = [0, 0], sizes = [8, 496], strides = [1, 1]} : vector<8x512xf32> to vector<8x496xf32>
    %137 = tpu.concatenate %135, %136 in 1 : vector<8x16xf32>, vector<8x496xf32> -> vector<8x512xf32>
    %cst_46 = arith.constant 0.000000e+00 : f32
    %138 = vector.shape_cast %36 : vector<1x512xi1> to vector<1x512xi1>
    %139 = vector.broadcast %138 : vector<1x512xi1> to vector<8x512xi1>
    %140 = vector.broadcast %cst_46 : f32 to vector<8x512xf32>
    %141 = arith.select %139, %137, %140 : vector<8x512xi1>, vector<8x512xf32>
    %142 = vector.extract_strided_slice %127 {offsets = [0, 497], sizes = [8, 15], strides = [1, 1]} : vector<8x512xf32> to vector<8x15xf32>
    %143 = vector.extract_strided_slice %127 {offsets = [0, 0], sizes = [8, 497], strides = [1, 1]} : vector<8x512xf32> to vector<8x497xf32>
    %144 = tpu.concatenate %142, %143 in 1 : vector<8x15xf32>, vector<8x497xf32> -> vector<8x512xf32>
    %cst_47 = arith.constant 0.000000e+00 : f32
    %145 = vector.shape_cast %51 : vector<1x512xi1> to vector<1x512xi1>
    %146 = vector.broadcast %145 : vector<1x512xi1> to vector<8x512xi1>
    %147 = vector.broadcast %cst_47 : f32 to vector<8x512xf32>
    %148 = arith.select %146, %144, %147 : vector<8x512xi1>, vector<8x512xf32>
    %149 = vector.extract_strided_slice %127 {offsets = [0, 511], sizes = [8, 1], strides = [1, 1]} : vector<8x512xf32> to vector<8x1xf32>
    %150 = vector.extract_strided_slice %127 {offsets = [0, 0], sizes = [8, 511], strides = [1, 1]} : vector<8x512xf32> to vector<8x511xf32>
    %151 = tpu.concatenate %149, %150 in 1 : vector<8x1xf32>, vector<8x511xf32> -> vector<8x512xf32>
    %cst_48 = arith.constant 0.000000e+00 : f32
    %152 = vector.shape_cast %66 : vector<1x512xi1> to vector<1x512xi1>
    %153 = vector.broadcast %152 : vector<1x512xi1> to vector<8x512xi1>
    %154 = vector.broadcast %cst_48 : f32 to vector<8x512xf32>
    %155 = arith.select %153, %151, %154 : vector<8x512xi1>, vector<8x512xf32>
    %156 = vector.extract_strided_slice %127 {offsets = [0, 1], sizes = [8, 511], strides = [1, 1]} : vector<8x512xf32> to vector<8x511xf32>
    %157 = vector.extract_strided_slice %127 {offsets = [0, 0], sizes = [8, 1], strides = [1, 1]} : vector<8x512xf32> to vector<8x1xf32>
    %158 = tpu.concatenate %156, %157 in 1 : vector<8x511xf32>, vector<8x1xf32> -> vector<8x512xf32>
    %cst_49 = arith.constant 0.000000e+00 : f32
    %159 = vector.shape_cast %81 : vector<1x512xi1> to vector<1x512xi1>
    %160 = vector.broadcast %159 : vector<1x512xi1> to vector<8x512xi1>
    %161 = vector.broadcast %cst_49 : f32 to vector<8x512xf32>
    %162 = arith.select %160, %158, %161 : vector<8x512xi1>, vector<8x512xf32>
    %163 = vector.extract_strided_slice %127 {offsets = [0, 15], sizes = [8, 497], strides = [1, 1]} : vector<8x512xf32> to vector<8x497xf32>
    %164 = vector.extract_strided_slice %127 {offsets = [0, 0], sizes = [8, 15], strides = [1, 1]} : vector<8x512xf32> to vector<8x15xf32>
    %165 = tpu.concatenate %163, %164 in 1 : vector<8x497xf32>, vector<8x15xf32> -> vector<8x512xf32>
    %cst_50 = arith.constant 0.000000e+00 : f32
    %166 = vector.shape_cast %96 : vector<1x512xi1> to vector<1x512xi1>
    %167 = vector.broadcast %166 : vector<1x512xi1> to vector<8x512xi1>
    %168 = vector.broadcast %cst_50 : f32 to vector<8x512xf32>
    %169 = arith.select %167, %165, %168 : vector<8x512xi1>, vector<8x512xf32>
    %170 = vector.extract_strided_slice %127 {offsets = [0, 16], sizes = [8, 496], strides = [1, 1]} : vector<8x512xf32> to vector<8x496xf32>
    %171 = vector.extract_strided_slice %127 {offsets = [0, 0], sizes = [8, 16], strides = [1, 1]} : vector<8x512xf32> to vector<8x16xf32>
    %172 = tpu.concatenate %170, %171 in 1 : vector<8x496xf32>, vector<8x16xf32> -> vector<8x512xf32>
    %cst_51 = arith.constant 0.000000e+00 : f32
    %173 = vector.shape_cast %111 : vector<1x512xi1> to vector<1x512xi1>
    %174 = vector.broadcast %173 : vector<1x512xi1> to vector<8x512xi1>
    %175 = vector.broadcast %cst_51 : f32 to vector<8x512xf32>
    %176 = arith.select %174, %172, %175 : vector<8x512xi1>, vector<8x512xf32>
    %177 = vector.extract_strided_slice %127 {offsets = [0, 17], sizes = [8, 495], strides = [1, 1]} : vector<8x512xf32> to vector<8x495xf32>
    %178 = vector.extract_strided_slice %127 {offsets = [0, 0], sizes = [8, 17], strides = [1, 1]} : vector<8x512xf32> to vector<8x17xf32>
    %179 = tpu.concatenate %177, %178 in 1 : vector<8x495xf32>, vector<8x17xf32> -> vector<8x512xf32>
    %cst_52 = arith.constant 0.000000e+00 : f32
    %180 = vector.shape_cast %126 : vector<1x512xi1> to vector<1x512xi1>
    %181 = vector.broadcast %180 : vector<1x512xi1> to vector<8x512xi1>
    %182 = vector.broadcast %cst_52 : f32 to vector<8x512xf32>
    %183 = arith.select %181, %179, %182 : vector<8x512xi1>, vector<8x512xf32>
    %184 = tpu.concatenate %134, %141, %148, %155, %127, %162, %169, %176, %183 in 0 : vector<8x512xf32>, vector<8x512xf32>, vector<8x512xf32>, vector<8x512xf32>, vector<8x512xf32>, vector<8x512xf32>, vector<8x512xf32>, vector<8x512xf32>, vector<8x512xf32> -> vector<72x512xf32>
    %c0_53 = arith.constant 0 : index
    %c0_54 = arith.constant 0 : index
    %185 = vector.load %arg1[%c0_53, %c0_54] : memref<16x72xf32, #tpu.memory_space<vmem>>, vector<16x72xf32>
    %cst_55 = arith.constant dense<0.000000e+00> : vector<16x512xf32>
    %186 = tpu.matmul %185, %184, %cst_55 {dimension_numbers = #tpu.dot_dimension_numbers<[1], [0], [0], [1], [0, 0, 1, 1], [], []>} : vector<16x72xf32>, vector<72x512xf32>, vector<16x512xf32> -> vector<16x512xf32>
    %187 = vector.extract_strided_slice %186 {offsets = [0, 0], sizes = [8, 512], strides = [1, 1]} : vector<16x512xf32> to vector<8x512xf32>
    %188 = vector.extract_strided_slice %186 {offsets = [8, 0], sizes = [8, 512], strides = [1, 1]} : vector<16x512xf32> to vector<8x512xf32>
    %c0_56 = arith.constant 0 : index
    %c0_57 = arith.constant 0 : index
    %189 = vector.load %arg7[%c0_56, %c0_57] : memref<8x1xf32, #tpu.memory_space<vmem>>, vector<8x1xf32>
    %190 = vector.broadcast %189 : vector<8x1xf32> to vector<8x512xf32>
    %191 = arith.addf %188, %190 : vector<8x512xf32>
    %c0_58 = arith.constant 0 : index
    %c0_59 = arith.constant 0 : index
    %192 = vector.load %arg2[%c0_58, %c0_59] : memref<8x1xf32, #tpu.memory_space<vmem>>, vector<8x1xf32>
    %c0_60 = arith.constant 0 : index
    %c0_61 = arith.constant 0 : index
    %193 = vector.load %arg3[%c0_60, %c0_61] : memref<8x1xf32, #tpu.memory_space<vmem>>, vector<8x1xf32>
    %cst_62 = arith.constant dense<0.000000e+00> : vector<8xf32>
    %194 = vector.multi_reduction <add>, %187, %cst_62 [1] : vector<8x512xf32> to vector<8xf32>
    %195 = vector.shape_cast %194 : vector<8xf32> to vector<8x1xf32>
    %196 = arith.mulf %187, %187 : vector<8x512xf32>
    %cst_63 = arith.constant dense<0.000000e+00> : vector<8xf32>
    %197 = vector.multi_reduction <add>, %196, %cst_63 [1] : vector<8x512xf32> to vector<8xf32>
    %198 = vector.shape_cast %197 : vector<8xf32> to vector<8x1xf32>
    %cst_64 = arith.constant 0.001953125 : f32
    %199 = vector.broadcast %cst_64 : f32 to vector<8x1xf32>
    %200 = arith.mulf %195, %199 : vector<8x1xf32>
    %cst_65 = arith.constant 0.001953125 : f32
    %201 = vector.broadcast %cst_65 : f32 to vector<8x1xf32>
    %202 = arith.mulf %198, %201 : vector<8x1xf32>
    %203 = arith.mulf %200, %200 : vector<8x1xf32>
    %204 = arith.subf %202, %203 : vector<8x1xf32>
    %cst_66 = arith.constant 0.000000e+00 : f32
    %205 = vector.broadcast %cst_66 : f32 to vector<8x1xf32>
    %206 = arith.maximumf %204, %205 : vector<8x1xf32>
    %cst_67 = arith.constant 9.99999974E-6 : f32
    %207 = vector.broadcast %cst_67 : f32 to vector<8x1xf32>
    %208 = arith.addf %206, %207 : vector<8x1xf32>
    %209 = math.rsqrt %208 : vector<8x1xf32>
    %210 = arith.mulf %192, %209 : vector<8x1xf32>
    %211 = arith.mulf %200, %210 : vector<8x1xf32>
    %212 = arith.subf %193, %211 : vector<8x1xf32>
    %213 = vector.broadcast %210 : vector<8x1xf32> to vector<8x512xf32>
    %214 = arith.mulf %187, %213 : vector<8x512xf32>
    %215 = vector.broadcast %212 : vector<8x1xf32> to vector<8x512xf32>
    %216 = arith.addf %214, %215 : vector<8x512xf32>
    %cst_68 = arith.constant 0.000000e+00 : f32
    %217 = vector.broadcast %cst_68 : f32 to vector<8x512xf32>
    %218 = arith.maximumf %216, %217 : vector<8x512xf32>
    %219 = vector.extract_strided_slice %218 {offsets = [0, 495], sizes = [8, 17], strides = [1, 1]} : vector<8x512xf32> to vector<8x17xf32>
    %220 = vector.extract_strided_slice %218 {offsets = [0, 0], sizes = [8, 495], strides = [1, 1]} : vector<8x512xf32> to vector<8x495xf32>
    %221 = tpu.concatenate %219, %220 in 1 : vector<8x17xf32>, vector<8x495xf32> -> vector<8x512xf32>
    %cst_69 = arith.constant 0.000000e+00 : f32
    %222 = vector.shape_cast %21 : vector<1x512xi1> to vector<1x512xi1>
    %223 = vector.broadcast %222 : vector<1x512xi1> to vector<8x512xi1>
    %224 = vector.broadcast %cst_69 : f32 to vector<8x512xf32>
    %225 = arith.select %223, %221, %224 : vector<8x512xi1>, vector<8x512xf32>
    %226 = vector.extract_strided_slice %218 {offsets = [0, 496], sizes = [8, 16], strides = [1, 1]} : vector<8x512xf32> to vector<8x16xf32>
    %227 = vector.extract_strided_slice %218 {offsets = [0, 0], sizes = [8, 496], strides = [1, 1]} : vector<8x512xf32> to vector<8x496xf32>
    %228 = tpu.concatenate %226, %227 in 1 : vector<8x16xf32>, vector<8x496xf32> -> vector<8x512xf32>
    %cst_70 = arith.constant 0.000000e+00 : f32
    %229 = vector.shape_cast %36 : vector<1x512xi1> to vector<1x512xi1>
    %230 = vector.broadcast %229 : vector<1x512xi1> to vector<8x512xi1>
    %231 = vector.broadcast %cst_70 : f32 to vector<8x512xf32>
    %232 = arith.select %230, %228, %231 : vector<8x512xi1>, vector<8x512xf32>
    %233 = vector.extract_strided_slice %218 {offsets = [0, 497], sizes = [8, 15], strides = [1, 1]} : vector<8x512xf32> to vector<8x15xf32>
    %234 = vector.extract_strided_slice %218 {offsets = [0, 0], sizes = [8, 497], strides = [1, 1]} : vector<8x512xf32> to vector<8x497xf32>
    %235 = tpu.concatenate %233, %234 in 1 : vector<8x15xf32>, vector<8x497xf32> -> vector<8x512xf32>
    %cst_71 = arith.constant 0.000000e+00 : f32
    %236 = vector.shape_cast %51 : vector<1x512xi1> to vector<1x512xi1>
    %237 = vector.broadcast %236 : vector<1x512xi1> to vector<8x512xi1>
    %238 = vector.broadcast %cst_71 : f32 to vector<8x512xf32>
    %239 = arith.select %237, %235, %238 : vector<8x512xi1>, vector<8x512xf32>
    %240 = vector.extract_strided_slice %218 {offsets = [0, 511], sizes = [8, 1], strides = [1, 1]} : vector<8x512xf32> to vector<8x1xf32>
    %241 = vector.extract_strided_slice %218 {offsets = [0, 0], sizes = [8, 511], strides = [1, 1]} : vector<8x512xf32> to vector<8x511xf32>
    %242 = tpu.concatenate %240, %241 in 1 : vector<8x1xf32>, vector<8x511xf32> -> vector<8x512xf32>
    %cst_72 = arith.constant 0.000000e+00 : f32
    %243 = vector.shape_cast %66 : vector<1x512xi1> to vector<1x512xi1>
    %244 = vector.broadcast %243 : vector<1x512xi1> to vector<8x512xi1>
    %245 = vector.broadcast %cst_72 : f32 to vector<8x512xf32>
    %246 = arith.select %244, %242, %245 : vector<8x512xi1>, vector<8x512xf32>
    %247 = vector.extract_strided_slice %218 {offsets = [0, 1], sizes = [8, 511], strides = [1, 1]} : vector<8x512xf32> to vector<8x511xf32>
    %248 = vector.extract_strided_slice %218 {offsets = [0, 0], sizes = [8, 1], strides = [1, 1]} : vector<8x512xf32> to vector<8x1xf32>
    %249 = tpu.concatenate %247, %248 in 1 : vector<8x511xf32>, vector<8x1xf32> -> vector<8x512xf32>
    %cst_73 = arith.constant 0.000000e+00 : f32
    %250 = vector.shape_cast %81 : vector<1x512xi1> to vector<1x512xi1>
    %251 = vector.broadcast %250 : vector<1x512xi1> to vector<8x512xi1>
    %252 = vector.broadcast %cst_73 : f32 to vector<8x512xf32>
    %253 = arith.select %251, %249, %252 : vector<8x512xi1>, vector<8x512xf32>
    %254 = vector.extract_strided_slice %218 {offsets = [0, 15], sizes = [8, 497], strides = [1, 1]} : vector<8x512xf32> to vector<8x497xf32>
    %255 = vector.extract_strided_slice %218 {offsets = [0, 0], sizes = [8, 15], strides = [1, 1]} : vector<8x512xf32> to vector<8x15xf32>
    %256 = tpu.concatenate %254, %255 in 1 : vector<8x497xf32>, vector<8x15xf32> -> vector<8x512xf32>
    %cst_74 = arith.constant 0.000000e+00 : f32
    %257 = vector.shape_cast %96 : vector<1x512xi1> to vector<1x512xi1>
    %258 = vector.broadcast %257 : vector<1x512xi1> to vector<8x512xi1>
    %259 = vector.broadcast %cst_74 : f32 to vector<8x512xf32>
    %260 = arith.select %258, %256, %259 : vector<8x512xi1>, vector<8x512xf32>
    %261 = vector.extract_strided_slice %218 {offsets = [0, 16], sizes = [8, 496], strides = [1, 1]} : vector<8x512xf32> to vector<8x496xf32>
    %262 = vector.extract_strided_slice %218 {offsets = [0, 0], sizes = [8, 16], strides = [1, 1]} : vector<8x512xf32> to vector<8x16xf32>
    %263 = tpu.concatenate %261, %262 in 1 : vector<8x496xf32>, vector<8x16xf32> -> vector<8x512xf32>
    %cst_75 = arith.constant 0.000000e+00 : f32
    %264 = vector.shape_cast %111 : vector<1x512xi1> to vector<1x512xi1>
    %265 = vector.broadcast %264 : vector<1x512xi1> to vector<8x512xi1>
    %266 = vector.broadcast %cst_75 : f32 to vector<8x512xf32>
    %267 = arith.select %265, %263, %266 : vector<8x512xi1>, vector<8x512xf32>
    %268 = vector.extract_strided_slice %218 {offsets = [0, 17], sizes = [8, 495], strides = [1, 1]} : vector<8x512xf32> to vector<8x495xf32>
    %269 = vector.extract_strided_slice %218 {offsets = [0, 0], sizes = [8, 17], strides = [1, 1]} : vector<8x512xf32> to vector<8x17xf32>
    %270 = tpu.concatenate %268, %269 in 1 : vector<8x495xf32>, vector<8x17xf32> -> vector<8x512xf32>
    %cst_76 = arith.constant 0.000000e+00 : f32
    %271 = vector.shape_cast %126 : vector<1x512xi1> to vector<1x512xi1>
    %272 = vector.broadcast %271 : vector<1x512xi1> to vector<8x512xi1>
    %273 = vector.broadcast %cst_76 : f32 to vector<8x512xf32>
    %274 = arith.select %272, %270, %273 : vector<8x512xi1>, vector<8x512xf32>
    %275 = tpu.concatenate %225, %232, %239, %246, %218, %253, %260, %267, %274 in 0 : vector<8x512xf32>, vector<8x512xf32>, vector<8x512xf32>, vector<8x512xf32>, vector<8x512xf32>, vector<8x512xf32>, vector<8x512xf32>, vector<8x512xf32>, vector<8x512xf32> -> vector<72x512xf32>
    %c0_77 = arith.constant 0 : index
    %c0_78 = arith.constant 0 : index
    %276 = vector.load %arg4[%c0_77, %c0_78] : memref<8x72xf32, #tpu.memory_space<vmem>>, vector<8x72xf32>
    %cst_79 = arith.constant dense<0.000000e+00> : vector<8x512xf32>
    %277 = tpu.matmul %276, %275, %cst_79 {dimension_numbers = #tpu.dot_dimension_numbers<[1], [0], [0], [1], [0, 0, 1, 1], [], []>} : vector<8x72xf32>, vector<72x512xf32>, vector<8x512xf32> -> vector<8x512xf32>
    %c0_80 = arith.constant 0 : index
    %c0_81 = arith.constant 0 : index
    %278 = vector.load %arg5[%c0_80, %c0_81] : memref<8x1xf32, #tpu.memory_space<vmem>>, vector<8x1xf32>
    %c0_82 = arith.constant 0 : index
    %c0_83 = arith.constant 0 : index
    %279 = vector.load %arg6[%c0_82, %c0_83] : memref<8x1xf32, #tpu.memory_space<vmem>>, vector<8x1xf32>
    %cst_84 = arith.constant dense<0.000000e+00> : vector<8xf32>
    %280 = vector.multi_reduction <add>, %277, %cst_84 [1] : vector<8x512xf32> to vector<8xf32>
    %281 = vector.shape_cast %280 : vector<8xf32> to vector<8x1xf32>
    %282 = arith.mulf %277, %277 : vector<8x512xf32>
    %cst_85 = arith.constant dense<0.000000e+00> : vector<8xf32>
    %283 = vector.multi_reduction <add>, %282, %cst_85 [1] : vector<8x512xf32> to vector<8xf32>
    %284 = vector.shape_cast %283 : vector<8xf32> to vector<8x1xf32>
    %cst_86 = arith.constant 0.001953125 : f32
    %285 = vector.broadcast %cst_86 : f32 to vector<8x1xf32>
    %286 = arith.mulf %281, %285 : vector<8x1xf32>
    %cst_87 = arith.constant 0.001953125 : f32
    %287 = vector.broadcast %cst_87 : f32 to vector<8x1xf32>
    %288 = arith.mulf %284, %287 : vector<8x1xf32>
    %289 = arith.mulf %286, %286 : vector<8x1xf32>
    %290 = arith.subf %288, %289 : vector<8x1xf32>
    %cst_88 = arith.constant 0.000000e+00 : f32
    %291 = vector.broadcast %cst_88 : f32 to vector<8x1xf32>
    %292 = arith.maximumf %290, %291 : vector<8x1xf32>
    %cst_89 = arith.constant 9.99999974E-6 : f32
    %293 = vector.broadcast %cst_89 : f32 to vector<8x1xf32>
    %294 = arith.addf %292, %293 : vector<8x1xf32>
    %295 = math.rsqrt %294 : vector<8x1xf32>
    %296 = arith.mulf %278, %295 : vector<8x1xf32>
    %297 = arith.mulf %286, %296 : vector<8x1xf32>
    %298 = arith.subf %279, %297 : vector<8x1xf32>
    %299 = vector.broadcast %296 : vector<8x1xf32> to vector<8x512xf32>
    %300 = arith.mulf %277, %299 : vector<8x512xf32>
    %301 = vector.broadcast %298 : vector<8x1xf32> to vector<8x512xf32>
    %302 = arith.addf %300, %301 : vector<8x512xf32>
    %303 = arith.addf %302, %191 : vector<8x512xf32>
    %cst_90 = arith.constant 0.000000e+00 : f32
    %304 = vector.broadcast %cst_90 : f32 to vector<8x512xf32>
    %305 = arith.maximumf %303, %304 : vector<8x512xf32>
    %c0_91 = arith.constant 0 : index
    %c0_92 = arith.constant 0 : index
    %306 = vector.load %arg8[%c0_91, %c0_92] : memref<8x512xf32, #tpu.memory_space<vmem>>, vector<8x512xf32>
    tpu.vector_store %arg8[%c0_91, %c0_92], %305 {strides = array<i32>} : memref<8x512xf32, #tpu.memory_space<vmem>>, vector<8x512xf32>,
    return
  }
}

</mosaic_0001>

<bundles_post_ra>
// kernel: resblock_forward.1
= control target key start
LH: loop header
LB: loop body
LE: loop exit
PB: predicated region body
PF: predicated region fallthrough
CT: control target
= control target key end

     0   :  { %s1018_s9 = smov 112   ;;  %s1019_s10 = smov 111   ;;  %v29_v4 = vlaneseq  ;;  %v1850_v21 = vmov 0  ;;  %v1852_v24 = vmov 0  ;;  %vm1813_vm7 = vcmask 908288   ;;  %s1803_s0 = inlined_call_operand.vmem [shape: f32[8,512], index: 0, kind: input, shape index: {}]   ;;  %s1804_s1 = inlined_call_operand.vmem [shape: f32[16,72], index: 1, kind: input, shape index: {}]   ;;  %s1805_s2 = inlined_call_operand.vmem [shape: f32[8,1], index: 2, kind: input, shape index: {}]   ;;  %s1806_s3 = inlined_call_operand.vmem [shape: f32[8,1], index: 3, kind: input, shape index: {}]   ;;  %s1807_s7 = inlined_call_operand.vmem [shape: f32[8,1], index: 7, kind: input, shape index: {}]   ;;  %s1808_s4 = inlined_call_operand.vmem [shape: f32[8,72], index: 4, kind: input, shape index: {}]   ;;  %s1809_s5 = inlined_call_operand.vmem [shape: f32[8,1], index: 5, kind: input, shape index: {}]   ;;  %s1810_s6 = inlined_call_operand.vmem [shape: f32[8,1], index: 6, kind: input, shape index: {}]   ;;  %s1811_s8 = inlined_call_operand.vmem [shape: f32[8,512], index: 8, kind: output, shape index: {}]  }
   0x1   :  { %v1075_v0 = vld [vmem:[%s1803_s0 + $0x10] sm:$0xff]  ;;  %v1080_v1 = vld [vmem:[%s1803_s0] sm:$0xff]  ;;  %v1091_v2 = vld [vmem:[%s1803_s0 + $0x18] sm:$0xff]  ;;  %s1020_s13 = smov 113   ;;  %s1021_s16 = smov 127   ;;  %v1856_v34 = vmov 0 }
   0x2   :  { %378 = vrot.lane.b32.xlu1 %v1075_v0, %s1018_s9  ;;  %408 = vrot.lane.b32.xlu0 %v1075_v0, %s1019_s10  ;;  %v1102_v3 = vld [vmem:[%s1803_s0 + $0x8] sm:$0xff]  ;;  %s1022_s0 = smov 1   ;;  %s1023_s17 = smov 15   ;;  %v1156_v5 = vand.u32 127, %v29_v4  ;;  %v1858_v40 = vmov 0  ;;  %v1860_v41 = vmov 0 }
   0x3   :  { %404 = vrot.lane.b32.xlu2 %v1080_v1, %s1019_s10  ;;  %s1024_s18 = smov 16   ;;  %s1025_s19 = smov 17   ;;  %v1862_v42 = vmov 0  ;;  %v1864_v44 = vmov 0  ;;  %v1866_v52 = vmov 0  ;;  %v1868_v57 = vmov 0 }
   0x4   :  { %v38_v6 = vshra.s32 %v1156_v5, 4  ;;  %v1160_v8 = vadd.s32 128, %v1156_v5  ;;  %v34_v11 = vand.u32 15, %v1156_v5  ;;  %v32_v13 = vadd.s32 256, %v1156_v5 }
   0x5   :  { %v33_v17 = vadd.s32 384, %v1156_v5  ;;  %v1872_v61 = vmov 0 }
   0x6   :  { %v1162_v9 = vand.u32 15, %v38_v6  ;;  %v39_v10 = vshra.s32 %v1160_v8, 4  ;;  %v1174_v16 = vadd.s32 1, %v34_v11  ;;  %v35_v18 = vand.u32 15, %v1160_v8 }
   0x7   :  { %v40_v19 = vshra.s32 %v32_v13, 4  ;;  %v41_v22 = vshra.s32 %v33_v17, 4  ;;  %v36_v29 = vand.u32 15, %v32_v13  ;;  %v37_v32 = vand.u32 15, %v33_v17 }
   0x8   :  { %v146_v12 = vadd.s32 1, %v1162_v9  ;;  %v1170_v15 = vand.u32 15, %v39_v10  ;;  %vm1814_vm2 = vcmp.lt.s32.totalorder %v1174_v16, 16  ;;  %v1186_v23 = vadd.s32 1, %v35_v18 }
   0x9   :  { %v1196_v25 = vand.u32 15, %v40_v19  ;;  %v1198_v27 = vand.u32 15, %v41_v22  ;;  %v1218_v35 = vadd.s32 1, %v36_v29  ;;  %v1222_v38 = vadd.s32 1, %v37_v32 }
   0xa   :  { %380 = vrot.lane.b32.xlu1 %v1091_v2, %s1018_s9  ;;  %410 = vrot.lane.b32.xlu0 %v1091_v2, %s1019_s10  ;;  %vm150_vm0 = vcmp.ge.s32.totalorder %v146_v12, 0  ;;  %vm154_vm1 = vcmp.lt.s32.totalorder %v146_v12, 16  ;;  %v147_v20 = vadd.s32 1, %v1170_v15  ;;  %vm1812_vm8 = vcmp.lt.s32.totalorder %v1186_v23, 16 }
   0xb   :  { %348 = vrot.lane.b32.xlu2 %v1075_v0, %s1020_s13  ;;  %vm1180_vm3 = vmand %vm150_vm0, %vm154_vm1  ;;  %v148_v31 = vadd.s32 1, %v1196_v25  ;;  %v149_v33 = vadd.s32 1, %v1198_v27  ;;  %vm1822_vm15 = vcmp.lt.s32.totalorder %v1218_v35, 16  ;;  %vm1816_vm1 = vcmp.lt.s32.totalorder %v1222_v38, 16 }
   0xc   :  { %v1851_v21 = vsel %vm1180_vm3, 4294967295, %v1850_v21  ;;  %vm1192_vm4 = vmand %vm1180_vm3, %vm1814_vm2  ;;  %vm151_vm5 = vcmp.ge.s32.totalorder %v147_v20, 0  ;;  %vm155_vm6 = vcmp.lt.s32.totalorder %v147_v20, 16  ;;  %v1255_v47 = vadd.s32 4294967295, %v36_v29 }
   0xd   :  { %v1853_v24 = vsel %vm1192_vm4, 4294967295, %v1852_v24  ;;  %vm1204_vm9 = vmand %vm151_vm5, %vm155_vm6  ;;  %vm152_vm11 = vcmp.ge.s32.totalorder %v148_v31, 0  ;;  %vm156_vm12 = vcmp.lt.s32.totalorder %v148_v31, 16  ;;  %vm153_vm13 = vcmp.ge.s32.totalorder %v149_v33, 0 }
   0xe   :  { %vm1214_vm10 = vmand %vm1204_vm9, %vm1812_vm8  ;;  %vm157_vm14 = vcmp.lt.s32.totalorder %v149_v33, 16  ;;  %v1263_v50 = vadd.s32 4294967295, %v37_v32  ;;  %v1316_v62 = vadd.s32 4294967295, %v34_v11  ;;  %v1327_v10 = vadd.s32 4294967295, %v35_v18 }
   0xf   :  { %v1857_v34 = vsel %vm1214_vm10, 4294967295, %v1856_v34  ;;  %vm1228_vm0 = vmand %vm152_vm11, %vm156_vm12  ;;  %vm1818_vm12 = vcmask 916480   ;;  %v1877_v11 = vmov 0  ;;  %v1879_v8 = vmov 0 }
  0x10   :  { %v1859_v40 = vsel %vm1228_vm0, 4294967295, %v1858_v40  ;;  %vm1233_vm5 = vmand %vm153_vm13, %vm157_vm14  ;;  %vm1815_vm13 = vcmp.ge.s32.totalorder %v1255_v47, 0  ;;  %vm1821_vm14 = vcmask 924672   ;;  %vm1817_vm8 = vcmp.ge.s32.totalorder %v1263_v50, 0 }
  0x11   :  { %v1861_v41 = vsel %vm1233_vm5, 4294967295, %v1860_v41  ;;  %vm1241_vm6 = vmand %vm1228_vm0, %vm1822_vm15  ;;  %v1896_v31 = vmov 0  ;;  %v48_v33 = vadd.s32 4294967295, %v1196_v25  ;;  %v1933_v17 = vmov 0 }
  0x12   :  { %350 = vrot.lane.b32.xlu0 %v1091_v2, %s1020_s13  ;;  %374 = vrot.lane.b32.xlu1 %v1080_v1, %s1018_s9  ;;  %v1863_v42 = vsel %vm1241_vm6, 4294967295, %v1862_v42  ;;  %vm1251_vm11 = vmand %vm1233_vm5, %vm1816_vm1  ;;  %vm124_vm1 = vcmp.lt.s32.totalorder %v1196_v25, 16 }
  0x13   :  { %406 = vrot.lane.b32.xlu2 %v1102_v3, %s1019_s10  ;;  %v1865_v44 = vsel %vm1251_vm11, 4294967295, %v1864_v44  ;;  %vm1286_vm2 = vmand %vm1233_vm5, %vm1817_vm8 }
  0x14   :  { %v1869_v57 = vsel %vm1286_vm2, 4294967295, %v1868_v57 }
  0x1a   :  { %318 = vrot.lane.b32.xlu0 %v1075_v0, %s1021_s16  ;;  %320 = vrot.lane.b32.xlu1 %v1091_v2, %s1021_s16 }
  0x1b   :  { %344 = vrot.lane.b32.xlu2 %v1080_v1, %s1020_s13 }
  0x22   :  { %376 = vrot.lane.b32.xlu0 %v1102_v3, %s1018_s9  ;;  %314 = vrot.lane.b32.xlu1 %v1080_v1, %s1021_s16 }
  0x23   :  { %346 = vrot.lane.b32.xlu2 %v1102_v3, %s1020_s13 }
  0x2a   :  { %289 = vrot.lane.b32.xlu0 %v1102_v3, %s1022_s0  ;;  %291 = vrot.lane.b32.xlu1 %v1075_v0, %s1022_s0 }
  0x2b   :  { %316 = vrot.lane.b32.xlu2 %v1102_v3, %s1021_s16 }
  0x32   :  { %259 = vrot.lane.b32.xlu0 %v1102_v3, %s1023_s17  ;;  %261 = vrot.lane.b32.xlu1 %v1075_v0, %s1023_s17 }
  0x33   :  { %284 = vrot.lane.b32.xlu2 %v1091_v2, %s1022_s0 }
  0x3a   :  { %229 = vrot.lane.b32.xlu0 %v1102_v3, %s1024_s18  ;;  %231 = vrot.lane.b32.xlu1 %v1075_v0, %s1024_s18 }
  0x3b   :  { %254 = vrot.lane.b32.xlu2 %v1091_v2, %s1023_s17 }
  0x42   :  { %287 = vrot.lane.b32.xlu0 %v1080_v1, %s1022_s0  ;;  %199 = vrot.lane.b32.xlu1 %v1102_v3, %s1025_s19 }
  0x43   :  { %201 = vrot.lane.b32.xlu2 %v1075_v0, %s1025_s19 }
  0x4a   :  { %224 = vrot.lane.b32.xlu0 %v1091_v2, %s1024_s18  ;;  %257 = vrot.lane.b32.xlu1 %v1080_v1, %s1023_s17 }
  0x4b   :  { %191 = vrot.lane.b32.xlu2 %v1091_v2, %s1025_s19 }
  0x52   :  { %227 = vrot.lane.b32.xlu0 %v1080_v1, %s1024_s18  ;;  %197 = vrot.lane.b32.xlu1 %v1080_v1, %s1025_s19 }
  0x5d   :  { %v405_v7 = vpop.permute.xlu2 %404 }
  0x65   :  { %v1168_v14 = vpop.permute.xlu2 %348 }
  0x6d   :  { %v407_v26 = vpop.permute.xlu2 %406 }
  0x6e   :  { %v413_v28 = vsel %vm1813_vm7, %v405_v7, %v407_v26 }
  0x6f   :  { %927 = vmatpush.msk.msra.mxu0 %vm1192_vm4, %v413_v28  ;;  %vm1832_vm4 = vcmp.ge.s32.totalorder %v1327_v10, 0 }
  0x74   :  { %v1220_v36 = vpop.permute.xlu1 %378  ;;  %v409_v37 = vpop.permute.xlu0 %408 }
  0x75   :  { %v414_v39 = vsel %vm1813_vm7, %v407_v26, %v409_v37  ;;  %v1245_v43 = vpop.permute.xlu2 %344  ;;  %v1891_v26 = vmov 0 }
  0x76   :  { %937 = vmatpush.msk.msra.mxu1 %vm1214_vm10, %v414_v39 }
  0x7c   :  { %v381_v45 = vpop.permute.xlu1 %380  ;;  %v411_v46 = vpop.permute.xlu0 %410 }
  0x7d   :  { %v415_v48 = vsel %vm1813_vm7, %v409_v37, %v411_v46  ;;  %v421_v49 = vsel %vm1813_vm7, %v411_v46, %v405_v7  ;;  %v385_v51 = vsel %vm1818_vm12, %v1220_v36, %v381_v45  ;;  %vm1275_vm7 = vmand %vm1228_vm0, %vm1815_vm13  ;;  %vm120_vm13 = vcmp.ge.s32.totalorder %v1196_v25, 0  ;;  %v347_v58 = vpop.permute.xlu2 %346 }
  0x7e   :  { %947 = vmatpush.msk.msra.mxu2 %vm1241_vm6, %v415_v48  ;;  %957 = vmatpush.msk.msra.mxu3 %vm1251_vm11, %v421_v49  ;;  %v1867_v52 = vsel %vm1275_vm7, 4294967295, %v1866_v52  ;;  %vm1300_vm8 = vmand %vm120_vm13, %vm124_vm1  ;;  %vm1831_vm13 = vcmp.ge.s32.totalorder %v1316_v62, 0  ;;  %vm1885_vm6 = vcmask 916480   ;;  %v49_v37 = vadd.s32 4294967295, %v1198_v27 }
  0x7f   :  { %vm1308_vm11 = vmand %vm1300_vm8, %vm1822_vm15  ;;  %vm118_vm15 = vcmp.ge.s32.totalorder %v1162_v9, 0  ;;  %v1901_v25 = vmov 0  ;;  %v1914_v49 = vmov 0 }
  0x80   :  { %948 = vmatpush.msk.msra.mxu2 %vm1228_vm0, %v385_v51  ;;  %v1873_v61 = vsel %vm1308_vm11, 4294967295, %v1872_v61  ;;  %vm1886_vm10 = vmmov %vm1885_vm6 }
  0x84   :  { %v351_v53 = vpop.permute.xlu0 %350  ;;  %v375_v54 = vpop.permute.xlu1 %374 }
  0x85   :  { %v355_v55 = vsel %vm1821_vm14, %v1168_v14, %v351_v53  ;;  %v391_v56 = vsel %vm1818_vm12, %v381_v45, %v375_v54  ;;  %v361_v59 = vsel %vm1821_vm14, %v351_v53, %v1245_v43  ;;  %vm1824_vm12 = vcmask 1039360   ;;  %v317_v5 = vpop.permute.xlu2 %316 }
  0x86   :  { %949 = vmatpush.msk.msra.mxu2 %vm1275_vm7, %v355_v55  ;;  %958 = vmatpush.msk.msra.mxu3 %vm1233_vm5, %v391_v56  ;;  %vm121_vm5 = vcmp.ge.s32.totalorder %v1198_v27, 0  ;;  %vm125_vm14 = vcmp.lt.s32.totalorder %v1198_v27, 16  ;;  %vm1347_vm7 = vmand %vm1180_vm3, %vm1831_vm13  ;;  %vm1887_vm13 = vcmask 1039360  }
  0x87   :  { %vm1321_vm1 = vmand %vm121_vm5, %vm125_vm14  ;;  %vm119_vm14 = vcmp.ge.s32.totalorder %v1170_v15, 0  ;;  %v1880_v8 = vsel %vm1347_vm7, 4294967295, %v1879_v8 }
  0x88   :  { %959 = vmatpush.msk.msra.mxu3 %vm1286_vm2, %v361_v59  ;;  %vm122_vm2 = vcmp.lt.s32.totalorder %v1162_v9, 16  ;;  %v47_v59 = vadd.s32 4294967295, %v1170_v15 }
  0x89   :  { %vm1352_vm0 = vmand %vm118_vm15, %vm122_vm2  ;;  %vm1890_vm15 = vcmp.lt.s32.totalorder %v1174_v16, 16 }
  0x8a   :  { %vm1368_vm2 = vmand %vm1204_vm9, %vm1832_vm4 }
  0x8c   :  { %v319_v63 = vpop.permute.xlu0 %318  ;;  %v321_v4 = vpop.permute.xlu1 %320 }
  0x8d   :  { %v325_v6 = vsel %vm1824_vm12, %v319_v63, %v321_v4  ;;  %vm1876_vm12 = vcmp.lt.s32.totalorder %v1222_v38, 16  ;;  %v285_v32 = vpop.permute.xlu2 %284 }
  0x8e   :  { %950 = vmatpush.msk.msra.mxu2 %vm1308_vm11, %v325_v6  ;;  %vm1337_vm5 = vmand %vm1321_vm1, %vm1876_vm12  ;;  %vm123_vm11 = vcmp.lt.s32.totalorder %v1170_v15, 16  ;;  %v1923_v6 = vmov 0 }
  0x8f   :  { %v1878_v11 = vsel %vm1337_vm5, 4294967295, %v1877_v11  ;;  %vm1356_vm12 = vmand %vm119_vm14, %vm123_vm11 }
  0x90   :  { %500 = vmatpush.msra.mxu2 %v1075_v0 }
  0x94   :  { %v377_v12 = vpop.permute.xlu0 %376  ;;  %v315_v13 = vpop.permute.xlu1 %314 }
  0x95   :  { %v383_v18 = vsel %vm1885_vm6, %v375_v54, %v377_v12  ;;  %v384_v19 = vsel %vm1886_vm10, %v377_v12, %v1220_v36  ;;  %v331_v20 = vsel %vm1887_vm13, %v321_v4, %v315_v13  ;;  %vm1380_vm10 = vmand %vm1352_vm0, %vm1890_vm15  ;;  %vm1893_vm6 = vcmask 924672   ;;  %v255_v48 = vpop.permute.xlu2 %254 }
  0x96   :  { %928 = vmatpush.msk.msra.mxu0 %vm1180_vm3, %v383_v18  ;;  %938 = vmatpush.msk.msra.mxu1 %vm1204_vm9, %v384_v19  ;;  %v1892_v26 = vsel %vm1380_vm10, 4294967295, %v1891_v26  ;;  %v353_v28 = vsel %vm1893_vm6, %v1245_v43, %v347_v58  ;;  %vm1894_vm11 = vmmov %vm1893_vm6  ;;  %vm1895_vm13 = vcmp.lt.s32.totalorder %v1186_v23, 16  ;;  %vm1898_vm15 = vcmask 1039360  }
  0x97   :  { %960 = vmatpush.msk.msra.mxu3 %vm1337_vm5, %v331_v20  ;;  %v354_v29 = vsel %vm1894_vm11, %v347_v58, %v1168_v14  ;;  %vm1394_vm14 = vmand %vm1356_vm12, %vm1895_vm13  ;;  %v323_v36 = vsel %vm1898_vm15, %v315_v13, %v317_v5  ;;  %vm1900_vm11 = vcmp.ge.s32.totalorder %v1255_v47, 0  ;;  %vm56_vm5 = vcmp.ge.s32.totalorder %v48_v33, 0 }
  0x98   :  { %v1897_v31 = vsel %vm1394_vm14, 4294967295, %v1896_v31  ;;  %929 = vmatpush.msk.msra.mxu0 %vm1347_vm7, %v353_v28  ;;  %939 = vmatpush.msk.msra.mxu1 %vm1368_vm2, %v354_v29  ;;  %vm1899_vm6 = vmmov %vm1898_vm15  ;;  %vm1836_vm15 = vcmask 7168   ;;  %vm1910_vm7 = vcmp.lt.s32.totalorder %v1218_v35, 16  ;;  %v46_v58 = vadd.s32 4294967295, %v1162_v9 }
  0x99   :  { %v324_v14 = vsel %vm1899_vm6, %v317_v5, %v319_v63  ;;  %523 = vmatpush.msra.mxu3 %v1091_v2  ;;  %vm1415_vm13 = vmand %vm1300_vm8, %vm1900_vm11  ;;  %vm1903_vm6 = vcmp.ge.s32.totalorder %v1263_v50, 0  ;;  %v1904_v2 = vmov 0  ;;  %vm57_vm8 = vcmp.ge.s32.totalorder %v49_v37, 0 }
  0x9a   :  { %930 = vmatpush.msk.msra.mxu0 %vm1380_vm10, %v323_v36  ;;  %940 = vmatpush.msk.msra.mxu1 %vm1394_vm14, %v324_v14  ;;  %v1902_v25 = vsel %vm1415_vm13, 4294967295, %v1901_v25  ;;  %vm1423_vm4 = vmand %vm1321_vm1, %vm1903_vm6  ;;  %vm60_vm10 = vcmp.lt.s32.totalorder %v48_v33, 16  ;;  %vm61_vm11 = vcmp.lt.s32.totalorder %v49_v37, 16  ;;  %vm1925_vm3 = vcmask 7168  }
  0x9b   :  { %v1905_v2 = vsel %vm1423_vm4, 4294967295, %v1904_v2  ;;  %vm1435_vm1 = vmand %vm56_vm5, %vm60_vm10  ;;  %vm1848_vm14 = vcmask 588800   ;;  %v1936_v18 = vmov 0 }
  0x9c   :  { %v290_v27 = vpop.permute.xlu0 %289  ;;  %v292_v39 = vpop.permute.xlu1 %291  ;;  %454 = vmatpush.msra.mxu0 %v1080_v1  ;;  %477 = vmatpush.msra.mxu1 %v1102_v3  ;;  %vm1439_vm6 = vmand %vm57_vm8, %vm61_vm11  ;;  %v1911_v3 = vmov 0  ;;  %vm1919_vm11 = vcmp.ge.s32.totalorder %v1327_v10, 0  ;;  %vm58_vm8 = vcmp.lt.s32.totalorder %v46_v58, 16 }
  0x9d   :  { %v295_v43 = vsel %vm1836_vm15, %v290_v27, %v292_v39  ;;  %v296_v45 = vsel %vm1836_vm15, %v292_v39, %v285_v32  ;;  %vm1447_vm15 = vmand %vm1435_vm1, %vm1910_vm7  ;;  %vm1839_vm7 = vcmask 130048   ;;  %v202_v63 = vpop.permute.xlu2 %201  ;;  %v1951_v39 = vmov 0 }
  0x9e   :  { %951 = vmatpush.msk.msra.mxu2 %vm1415_vm13, %v295_v43  ;;  %961 = vmatpush.msk.msra.mxu3 %vm1423_vm4, %v296_v45  ;;  %v1912_v3 = vsel %vm1447_vm15, 4294967295, %v1911_v3  ;;  %vm1840_vm13 = vcmask 121856   ;;  %vm1913_vm4 = vcmp.lt.s32.totalorder %v1222_v38, 16 }
  0x9f   :  { %vm1455_vm5 = vmand %vm1439_vm6, %vm1913_vm4  ;;  %vm1916_vm4 = vcmp.ge.s32.totalorder %v1316_v62, 0 }
  0xa0   :  { %v1915_v49 = vsel %vm1455_vm5, 4294967295, %v1914_v49  ;;  %vm1474_vm10 = vmand %vm1352_vm0, %vm1916_vm4  ;;  %vm54_vm4 = vcmp.ge.s32.totalorder %v46_v58, 0 }
  0xa4   :  { %v260_v51 = vpop.permute.xlu0 %259  ;;  %v262_v53 = vpop.permute.xlu1 %261 }
  0xa5   :  { %v265_v35 = vsel %vm1840_vm13, %v260_v51, %v262_v53  ;;  %v266_v54 = vsel %vm1840_vm13, %v262_v53, %v255_v48  ;;  %vm1922_vm13 = vcmp.ge.s32.totalorder %v1255_v47, 0  ;;  %v434_v47 = vld [vmem:[%s1804_s1] sm:$0xff]  ;;  %v192_v28 = vpop.permute.xlu2 %191 }
  0xa6   :  { %952 = vmatpush.msk.msra.mxu2 %vm1447_vm15, %v265_v35  ;;  %962 = vmatpush.msk.msra.mxu3 %vm1455_vm5, %v266_v54  ;;  %vm1490_vm0 = vmand %vm1435_vm1, %vm1922_vm13  ;;  %vm55_vm5 = vcmp.ge.s32.totalorder %v47_v59, 0  ;;  %vm59_vm15 = vcmp.lt.s32.totalorder %v47_v59, 16 }
  0xa7   :  { %v1924_v6 = vsel %vm1490_vm0, 4294967295, %v1923_v6  ;;  %vm1506_vm13 = vmand %vm54_vm4, %vm58_vm8  ;;  %vm1940_vm4 = vcmask 130048  }
  0xac   :  { %v230_v38 = vpop.permute.xlu0 %229  ;;  %v232_v55 = vpop.permute.xlu1 %231 }
  0xad   :  { %v235_v56 = vsel %vm1839_vm7, %v230_v38, %v232_v55  ;;  %vm1482_vm7 = vmand %vm1356_vm12, %vm1919_vm11  ;;  %vm1927_vm11 = vcmask 138240  }
  0xae   :  { %953 = vmatpush.msk.msra.mxu2 %vm1435_vm1, %v235_v56  ;;  %vm1926_vm12 = vmmov %vm1925_vm3 }
  0xb4   :  { %v288_v9 = vpop.permute.xlu0 %287  ;;  %v200_v15 = vpop.permute.xlu1 %199 }
  0xb5   :  { %v301_v7 = vsel %vm1925_vm3, %v285_v32, %v288_v9  ;;  %v294_v5 = vsel %vm1926_vm12, %v288_v9, %v290_v27  ;;  %v205_v0 = vsel %vm1927_vm11, %v200_v15, %v202_v63  ;;  %vm1510_vm3 = vmand %vm55_vm5, %vm59_vm15  ;;  %vm1932_vm12 = vcmp.lt.s32.totalorder %v1174_v16, 16 }
  0xb6   :  { %931 = vmatpush.msk.msra.mxu0 %vm1474_vm10, %v301_v7  ;;  %941 = vmatpush.msk.msra.mxu1 %vm1482_vm7, %v294_v5  ;;  %vm1519_vm11 = vmand %vm1506_vm13, %vm1932_vm12  ;;  %vm1938_vm15 = vcmask 121856  }
  0xb7   :  { %954 = vmatpush.msk.msra.mxu2 %vm1490_vm0, %v205_v0  ;;  %v1934_v17 = vsel %vm1519_vm11, 4294967295, %v1933_v17  ;;  %vm1935_vm0 = vcmp.lt.s32.totalorder %v1186_v23, 16  ;;  %vm1939_vm5 = vmmov %vm1938_vm15 }
  0xb8   :  { %955 = vmatmul.msk.f32.vlgmr.msra.gmra.mxu2 %vm1848_vm14, %v434_v47  ;;  %vm1527_vm8 = vmand %vm1510_vm3, %vm1935_vm0  ;;  %vm1941_vm0 = vcmp.ge.s32.totalorder %v1263_v50, 0 }
  0xb9   :  { %v1937_v18 = vsel %vm1527_vm8, 4294967295, %v1936_v18  ;;  %vm1542_vm12 = vmand %vm1439_vm6, %vm1941_vm0  ;;  %vm1948_vm0 = vcmask 130048  }
  0xbc   :  { %v225_v19 = vpop.permute.xlu0 %224  ;;  %v258_v20 = vpop.permute.xlu1 %257 }
  0xbd   :  { %v271_v29 = vsel %vm1938_vm15, %v255_v48, %v258_v20  ;;  %v264_v16 = vsel %vm1939_vm5, %v258_v20, %v260_v51  ;;  %v236_v32 = vsel %vm1940_vm4, %v232_v55, %v225_v19  ;;  %vm1944_vm15 = vcmask 138240  }
  0xbe   :  { %932 = vmatpush.msk.msra.mxu0 %vm1519_vm11, %v271_v29  ;;  %942 = vmatpush.msk.msra.mxu1 %vm1527_vm8, %v264_v16  ;;  %v206_v33 = vsel %vm1944_vm15, %v202_v63, %v192_v28  ;;  %vm1945_vm5 = vcmp.ge.s32.totalorder %v1316_v62, 0  ;;  %vm1949_vm8 = vmmov %vm1948_vm0  ;;  %vm1950_vm15 = vcmp.ge.s32.totalorder %v1327_v10, 0 }
  0xbf   :  { %963 = vmatpush.msk.msra.mxu3 %vm1439_vm6, %v236_v32  ;;  %vm1556_vm4 = vmand %vm1506_vm13, %vm1945_vm5  ;;  %vm1953_vm5 = vcmask 138240  }
  0xc0   :  { %vm1566_vm11 = vmand %vm1510_vm3, %vm1950_vm15 }
  0xc1   :  { %964 = vmatpush.msk.msra.mxu3 %vm1542_vm12, %v206_v33  ;;  %v1952_v39 = vsel %vm1566_vm11, 4294967295, %v1951_v39 }
  0xc2   :  { %965 = vmatmul.msk.f32.vlgmr.msra.gmra.mxu3 %vm1848_vm14, %v434_v47  ;;  %vm1954_vm14 = vmmov %vm1953_vm5 }
  0xc4   :  { %v228_v36 = vpop.permute.xlu0 %227  ;;  %v198_v14 = vpop.permute.xlu1 %197 }
  0xc5   :  { %v241_v37 = vsel %vm1948_vm0, %v225_v19, %v228_v36  ;;  %v234_v27 = vsel %vm1949_vm8, %v228_v36, %v230_v38  ;;  %v211_v62 = vsel %vm1953_vm5, %v192_v28, %v198_v14  ;;  %v204_v43 = vsel %vm1954_vm14, %v198_v14, %v200_v15 }
  0xc6   :  { %933 = vmatpush.msk.msra.mxu0 %vm1506_vm13, %v241_v37  ;;  %943 = vmatpush.msk.msra.mxu1 %vm1510_vm3, %v234_v27  ;;  %vm1955_vm8 = vcmask 588800   ;;  %v1026_v15 = vmov 0   ;;  %v545_v37 = vld [vmem:[%s1805_s2] sm:$0xff] }
  0xc7   :  { %vm1956_vm0 = vmmov %vm1955_vm8  ;;  %1012 = vset.pattern.permute.xlu1 %v1026_v15  ;;  %1013 = vset.pattern.permute.xlu0 %v1026_v15 }
  0xc8   :  { %934 = vmatpush.msk.msra.mxu0 %vm1556_vm4, %v211_v62  ;;  %944 = vmatpush.msk.msra.mxu1 %vm1566_vm11, %v204_v43 }
  0xc9   :  { %935 = vmatmul.msk.f32.vlgmr.msra.gmra.mxu0 %vm1955_vm8, %v434_v47  ;;  %945 = vmatmul.msk.f32.vlgmr.msra.gmra.mxu1 %vm1956_vm0, %v434_v47  ;;  %vm1957_vm8 = vmmov %vm1956_vm0 }
 0x13b   :  { %v506_v10 = vpop.f32.mrf.mxu2 }
 0x13c   :  { %v554_v38 = vmul.f32 %v506_v10, %v506_v10 }
 0x145   :  { %v529_v45 = vpop.f32.mrf.mxu3 }
 0x146   :  { %v460_v48 = vpop.f32.mrf.mxu0  ;;  %v483_v51 = vpop.f32.mrf.mxu1  ;;  %v555_v56 = vmul.f32 %v529_v45, %v529_v45 }
 0x147   :  { %v552_v53 = vmul.f32 %v460_v48, %v460_v48  ;;  %v547_v35 = vadd.f32 %v483_v51, %v460_v48  ;;  %v553_v54 = vmul.f32 %v483_v51, %v483_v51 }
 0x149   :  { %v548_v55 = vadd.f32 %v547_v35, %v506_v10  ;;  %v556_v58 = vadd.f32 %v553_v54, %v552_v53  ;;  %v546_v35 = vld [vmem:[%s1806_s3] sm:$0xff] }
 0x14b   :  { %v549_v59 = vadd.f32 %v548_v55, %v529_v45  ;;  %v557_v63 = vadd.f32 %v556_v58, %v554_v38 }
 0x14d   :  { %550 = vadd.xlane.f32.xlu2 %v549_v59  ;;  %v558_v9 = vadd.f32 %v557_v63, %v555_v56 }
 0x14f   :  { %559 = vadd.xlane.f32.xlu0 %v558_v9 }
 0x1c0   :  { %v551_v7 = vpop.xlane.xlu2 %550 }
 0x1c1   :  { %v561_v5 = vmul.f32 0.001953125, %v551_v7 }
 0x1c2   :  { %v560_v0 = vpop.xlane.xlu0 %559 }
 0x1c3   :  { %v563_v47 = vmul.f32 %v561_v5, %v561_v5  ;;  %v562_v19 = vmul.f32 0.001953125, %v560_v0 }
 0x1c5   :  { %v564_v20 = vsub.f32 %v562_v19, %v563_v47 }
 0x1c7   :  { %v565_v28 = vmax.f32 %v564_v20, 0.0  ;;  %v535_v20 = vld [vmem:[%s1807_s7] sm:$0xff] }
 0x1c9   :  { %v566_v29 = vadd.f32 1e-05, %v565_v28 }
 0x1cb   :  { %1014 = vrsqrt.f32 %v566_v29  ;;  %vm573_vm15 = vweird.f32 %v566_v29 }
 0x1d1   :  { %v1015_v16 = vpop.eup %1014 }
 0x1d2   :  { %v568_v32 = vmul.f32 %v1015_v16, %v566_v29  ;;  %vm574_vm14 = vweird.f32 %v1015_v16 }
 0x1d3   :  { %vm575_vm5 = vmor %vm573_vm15, %vm574_vm14 }
 0x1d4   :  { %v569_v33 = vmul.f32 %v1015_v16, %v568_v32  ;;  %vm1958_vm14 = vmmov %vm1956_vm0 }
 0x1d5   :  { %vm1959_vm15 = vmmov %vm1956_vm0 }
 0x1d6   :  { %v570_v36 = vmul.f32 0.5, %v569_v33 }
 0x1d8   :  { %v571_v14 = vsub.f32 1.5, %v570_v36 }
 0x1da   :  { %v572_v27 = vmul.f32 %v1015_v16, %v571_v14 }
 0x1dc   :  { %v576_v62 = vsel %vm575_vm5, %v1015_v16, %v572_v27  ;;  %vm1960_vm5 = vcmask 908288  }
 0x1dd   :  { %v577_v43 = vmul.f32 %v576_v62, %v545_v37 }
 0x1df   :  { %582 = vperm.xlu1 %1012, %v577_v43   ;;  %v578_v53 = vmul.f32 %v577_v43, %v561_v5 }
 0x1e1   :  { %v579_v54 = vsub.f32 %v546_v35, %v578_v53 }
 0x1e7   :  { %591 = vperm.xlu1 %1012, %v579_v54  }
 0x251   :  { %v583_v38 = vpop.permute.xlu1 %582 }
 0x252   :  { %v587_v55 = vmul.f32 %v583_v38, %v506_v10  ;;  %v588_v56 = vmul.f32 %v583_v38, %v529_v45  ;;  %v586_v7 = vmul.f32 %v583_v38, %v483_v51  ;;  %v585_v45 = vmul.f32 %v583_v38, %v460_v48  ;;  %v435_v48 = vld [vmem:[%s1804_s1 + $0x8] sm:$0xff] }
 0x253   :  { %956 = vmatmul.msk.f32.gmra.mxu2 %vm1957_vm8, %v435_v48  ;;  %966 = vmatmul.msk.f32.gmra.mxu3 %vm1956_vm0, %v435_v48  ;;  %vm1961_vm8 = vnez %v1857_v34  ;;  %vm1962_vm0 = vmmov %vm1960_vm5 }
 0x254   :  { %936 = vmatmul.msk.f32.gmra.mxu0 %vm1958_vm14, %v435_v48  ;;  %946 = vmatmul.msk.f32.gmra.mxu1 %vm1959_vm15, %v435_v48  ;;  %vm1963_vm14 = vnez %v1863_v42  ;;  %vm1964_vm15 = vcmask 916480  }
 0x255   :  { %vm1965_vm11 = vmmov %vm1964_vm15 }
 0x259   :  { %v592_v58 = vpop.permute.xlu1 %591 }
 0x25a   :  { %v596_v59 = vadd.f32 %v592_v58, %v587_v55  ;;  %v597_v63 = vadd.f32 %v592_v58, %v588_v56  ;;  %v595_v5 = vadd.f32 %v592_v58, %v586_v7  ;;  %v594_v51 = vadd.f32 %v592_v58, %v585_v45 }
 0x25c   :  { %v1588_v9 = vmax.f32 %v596_v59, 0.0  ;;  %v1590_v15 = vmax.f32 %v597_v63, 0.0  ;;  %v1598_v10 = vmax.f32 %v595_v5, 0.0  ;;  %v1606_v0 = vmax.f32 %v594_v51, 0.0 }
 0x25e   :  { %738 = vrot.lane.b32.xlu2 %v1590_v15, %s1018_s9  ;;  %715 = vrot.lane.b32.xlu0 %v1588_v9, %s1020_s13 }
 0x25f   :  { %757 = vrot.lane.b32.xlu1 %v1588_v9, %s1019_s10 }
 0x266   :  { %694 = vrot.lane.b32.xlu0 %v1588_v9, %s1021_s16  ;;  %755 = vrot.lane.b32.xlu2 %v1598_v10, %s1019_s10 }
 0x267   :  { %759 = vrot.lane.b32.xlu1 %v1590_v15, %s1019_s10 }
 0x26e   :  { %734 = vrot.lane.b32.xlu0 %v1598_v10, %s1018_s9  ;;  %711 = vrot.lane.b32.xlu2 %v1606_v0, %s1020_s13 }
 0x26f   :  { %736 = vrot.lane.b32.xlu1 %v1588_v9, %s1018_s9 }
 0x276   :  { %674 = vrot.lane.b32.xlu0 %v1598_v10, %s1022_s0  ;;  %713 = vrot.lane.b32.xlu2 %v1598_v10, %s1020_s13 }
 0x277   :  { %753 = vrot.lane.b32.xlu1 %v1606_v0, %s1019_s10 }
 0x27e   :  { %653 = vrot.lane.b32.xlu0 %v1598_v10, %s1023_s17  ;;  %692 = vrot.lane.b32.xlu2 %v1598_v10, %s1021_s16 }
 0x27f   :  { %717 = vrot.lane.b32.xlu1 %v1590_v15, %s1020_s13 }
 0x286   :  { %632 = vrot.lane.b32.xlu0 %v1598_v10, %s1024_s18  ;;  %669 = vrot.lane.b32.xlu2 %v1590_v15, %s1022_s0 }
 0x287   :  { %732 = vrot.lane.b32.xlu1 %v1606_v0, %s1018_s9 }
 0x28e   :  { %672 = vrot.lane.b32.xlu0 %v1606_v0, %s1022_s0  ;;  %648 = vrot.lane.b32.xlu2 %v1590_v15, %s1023_s17 }
 0x28f   :  { %696 = vrot.lane.b32.xlu1 %v1590_v15, %s1021_s16 }
 0x296   :  { %627 = vrot.lane.b32.xlu0 %v1590_v15, %s1024_s18  ;;  %613 = vrot.lane.b32.xlu2 %v1588_v9, %s1025_s19 }
 0x297   :  { %690 = vrot.lane.b32.xlu1 %v1606_v0, %s1021_s16 }
 0x29e   :  { %630 = vrot.lane.b32.xlu0 %v1606_v0, %s1024_s18  ;;  %603 = vrot.lane.b32.xlu2 %v1590_v15, %s1025_s19 }
 0x29f   :  { %676 = vrot.lane.b32.xlu1 %v1588_v9, %s1022_s0 }
 0x2a7   :  { %655 = vrot.lane.b32.xlu1 %v1588_v9, %s1023_s17 }
 0x2af   :  { %634 = vrot.lane.b32.xlu1 %v1588_v9, %s1024_s18 }
 0x2b7   :  { %611 = vrot.lane.b32.xlu1 %v1598_v10, %s1025_s19 }
 0x2b8   :  { %v739_v47 = vpop.permute.xlu2 %738 }
 0x2bf   :  { %651 = vrot.lane.b32.xlu1 %v1606_v0, %s1023_s17 }
 0x2c0   :  { %v756_v19 = vpop.permute.xlu2 %755 }
 0x2c7   :  { %609 = vrot.lane.b32.xlu1 %v1606_v0, %s1025_s19 }
 0x2c8   :  { %v712_v28 = vpop.permute.xlu2 %711 }
 0x2cf   :  { %538 = vperm.xlu1 %1012, %v535_v20  }
 0x2d0   :  { %v716_v29 = vpop.permute.xlu0 %715  ;;  %v714_v36 = vpop.permute.xlu2 %713 }
 0x2d1   :  { %v758_v16 = vpop.permute.xlu1 %757  ;;  %v486_v13 = vpop.f32.mrf.mxu1 }
 0x2d2   :  { %v762_v32 = vsel %vm1960_vm5, %v756_v19, %v758_v16  ;;  %vm1966_vm5 = vnez %v1859_v40 }
 0x2d3   :  { %976 = vmatpush.msk.msrb.mxu1 %vm1961_vm8, %v762_v32  ;;  %vm1967_vm8 = vcmask 924672  }
 0x2d4   :  { %v720_v34 = vsel %vm1967_vm8, %v714_v36, %v716_v29 }
 0x2d6   :  { %v509_v12 = vpop.f32.mrf.mxu2 }
 0x2d8   :  { %v695_v33 = vpop.permute.xlu0 %694  ;;  %v693_v35 = vpop.permute.xlu2 %692 }
 0x2d9   :  { %v760_v14 = vpop.permute.xlu1 %759 }
 0x2da   :  { %v763_v37 = vsel %vm1962_vm0, %v758_v16, %v760_v14  ;;  %vm1968_vm0 = vcmask 1039360  }
 0x2db   :  { %985 = vmatpush.msk.msrb.mxu2 %vm1963_vm14, %v763_v37  ;;  %v699_v42 = vsel %vm1968_vm0, %v693_v35, %v695_v33  ;;  %vm1969_vm14 = vnez %v1897_v31  ;;  %vm1976_vm0 = vcmask 916480  }
 0x2e0   :  { %v735_v27 = vpop.permute.xlu0 %734 }
 0x2e1   :  { %v737_v62 = vpop.permute.xlu1 %736 }
 0x2e2   :  { %v741_v43 = vsel %vm1964_vm15, %v735_v27, %v737_v62  ;;  %v742_v53 = vsel %vm1965_vm11, %v737_v62, %v739_v47  ;;  %vm1970_vm11 = vcmask 908288   ;;  %vm1972_vm15 = vnez %v1853_v24 }
 0x2e3   :  { %977 = vmatpush.msk.msrb.mxu1 %vm1204_vm9, %v741_v43  ;;  %986 = vmatpush.msk.msrb.mxu2 %vm1966_vm5, %v742_v53  ;;  %vm1971_vm9 = vmmov %vm1970_vm11  ;;  %vm1973_vm5 = vnez %v1865_v44 }
 0x2e5   :  { %978 = vmatpush.msk.msrb.mxu1 %vm1368_vm2, %v720_v34  ;;  %vm1974_vm2 = vmmov %vm1967_vm8  ;;  %vm1975_vm8 = vnez %v1867_v52 }
 0x2e7   :  { %979 = vmatpush.msk.msrb.mxu1 %vm1969_vm14, %v699_v42  ;;  %vm1977_vm14 = vmmov %vm1976_vm0 }
 0x2e8   :  { %v675_v54 = vpop.permute.xlu0 %674 }
 0x2e9   :  { %809 = vmatpush.msrb.mxu1 %v1598_v10  ;;  %v754_v38 = vpop.permute.xlu1 %753  ;;  %v670_v10 = vpop.permute.xlu2 %669 }
 0x2ea   :  { %v761_v30 = vsel %vm1970_vm11, %v754_v38, %v756_v19  ;;  %v769_v55 = vsel %vm1971_vm9, %v760_v14, %v754_v38  ;;  %vm1978_vm11 = vnez %v1851_v21  ;;  %vm1979_vm9 = vnez %v1861_v41 }
 0x2eb   :  { %967 = vmatpush.msk.msrb.mxu0 %vm1972_vm15, %v761_v30  ;;  %994 = vmatpush.msk.msrb.mxu3 %vm1973_vm5, %v769_v55  ;;  %vm1980_vm15 = vmmov %vm1974_vm2 }
 0x2ec   :  { %v719_v24 = vsel %vm1980_vm15, %v712_v28, %v714_v36  ;;  %vm1981_vm5 = vmmov %vm1974_vm2 }
 0x2f0   :  { %v1695_v40 = vpop.permute.xlu0 %653 }
 0x2f1   :  { %v718_v22 = vpop.permute.xlu1 %717  ;;  %v649_v4 = vpop.permute.xlu2 %648 }
 0x2f2   :  { %v721_v31 = vsel %vm1974_vm2, %v716_v29, %v718_v22  ;;  %v727_v44 = vsel %vm1981_vm5, %v718_v22, %v712_v28  ;;  %vm1982_vm2 = vnez %v1880_v8  ;;  %vm1989_vm5 = vnez %v1892_v26 }
 0x2f3   :  { %987 = vmatpush.msk.msrb.mxu2 %vm1975_vm8, %v721_v31  ;;  %vm1983_vm8 = vnez %v1869_v57 }
 0x2f8   :  { %v1700_v56 = vpop.permute.xlu0 %632 }
 0x2f9   :  { %v733_v58 = vpop.permute.xlu1 %732 }
 0x2fa   :  { %v740_v59 = vsel %vm1976_vm0, %v733_v58, %v735_v27  ;;  %v748_v63 = vsel %vm1977_vm14, %v739_v47, %v733_v58  ;;  %vm1984_vm0 = vcmask 7168   ;;  %vm1985_vm14 = vcmask 1039360  }
 0x2fb   :  { %968 = vmatpush.msk.msrb.mxu0 %vm1978_vm11, %v740_v59  ;;  %995 = vmatpush.msk.msrb.mxu3 %vm1979_vm9, %v748_v63  ;;  %vm1986_vm11 = vnez %v1873_v61  ;;  %vm1987_vm9 = vmmov %vm1985_vm14 }
 0x2fc   :  { %vm1988_vm15 = vmmov %vm1987_vm9 }
 0x2fd   :  { %969 = vmatpush.msk.msrb.mxu0 %vm1982_vm2, %v719_v24  ;;  %996 = vmatpush.msk.msrb.mxu3 %vm1983_vm8, %v727_v44  ;;  %vm1990_vm2 = vnez %v1878_v11  ;;  %vm1992_vm8 = vmmov %vm1984_vm0  ;;  %v614_v11 = vpop.permute.xlu2 %613 }
 0x300   :  { %v673_v52 = vpop.permute.xlu0 %672 }
 0x301   :  { %v697_v7 = vpop.permute.xlu1 %696  ;;  %v678_v5 = vsel %vm1984_vm0, %v673_v52, %v675_v54 }
 0x302   :  { %980 = vmatpush.msk.msrb.mxu1 %vm1482_vm7, %v678_v5  ;;  %v700_v21 = vsel %vm1985_vm14, %v695_v33, %v697_v7  ;;  %vm1991_vm7 = vmmov %vm1984_vm0  ;;  %vm1993_vm14 = vnez %v1902_v25  ;;  %v463_v33 = vpop.f32.mrf.mxu0  ;;  %v858_v5 = vld [vmem:[%s1809_s5] sm:$0xff] }
 0x303   :  { %988 = vmatpush.msk.msrb.mxu2 %vm1986_vm11, %v700_v21  ;;  %v685_v61 = vsel %vm1991_vm7, %v670_v10, %v673_v52  ;;  %vm1994_vm11 = vnez %v1905_v2 }
 0x305   :  { %829 = vmatpush.msrb.mxu2 %v1588_v9  ;;  %v604_v60 = vpop.permute.xlu2 %603 }
 0x308   :  { %v628_v48 = vpop.permute.xlu0 %627 }
 0x309   :  { %v691_v41 = vpop.permute.xlu1 %690 }
 0x30a   :  { %v698_v8 = vsel %vm1987_vm9, %v691_v41, %v693_v35  ;;  %v706_v57 = vsel %vm1988_vm15, %v697_v7, %v691_v41  ;;  %vm1995_vm9 = vcmask 121856  }
 0x30b   :  { %970 = vmatpush.msk.msrb.mxu0 %vm1989_vm5, %v698_v8  ;;  %997 = vmatpush.msk.msrb.mxu3 %vm1990_vm2, %v706_v57  ;;  %vm1996_vm15 = vmmov %vm1995_vm9  ;;  %vm1998_vm5 = vnez %v1915_v49  ;;  %vm1999_vm2 = vcmask 130048   ;;  %v774_v49 = vld [vmem:[%s1808_s4] sm:$0xff] }
 0x30c   :  { %vm2000_vm7 = vmmov %vm1999_vm2  ;;  %v859_v57 = vld [vmem:[%s1810_s6] sm:$0xff] }
 0x30d   :  { %789 = vmatpush.msrb.mxu0 %v1606_v0  ;;  %849 = vmatpush.msrb.mxu3 %v1590_v15 }
 0x30f   :  { %971 = vmatpush.msk.msrb.mxu0 %vm1474_vm10, %v685_v61  ;;  %vm1997_vm10 = vnez %v1912_v3 }
 0x310   :  { %v631_v46 = vpop.permute.xlu0 %630 }
 0x311   :  { %v677_v9 = vpop.permute.xlu1 %676 }
 0x312   :  { %v679_v45 = vsel %vm1992_vm8, %v675_v54, %v677_v9  ;;  %v680_v51 = vsel %vm1984_vm0, %v677_v9, %v670_v10  ;;  %vm2001_vm8 = vcmask 138240   ;;  %vm2002_vm0 = vcmask 588800  }
 0x313   :  { %989 = vmatpush.msk.msrb.mxu2 %vm1993_vm14, %v679_v45  ;;  %998 = vmatpush.msk.msrb.mxu3 %vm1994_vm11, %v680_v51  ;;  %v617_v3 = vsel %vm2001_vm8, %v614_v11, %v604_v60  ;;  %vm2003_vm14 = vmmov %vm2001_vm8  ;;  %vm2004_vm11 = vnez %v1924_v6 }
 0x319   :  { %v656_v26 = vpop.permute.xlu1 %655 }
 0x31a   :  { %v658_v15 = vsel %vm1995_vm9, %v1695_v40, %v656_v26  ;;  %v659_v0 = vsel %vm1996_vm15, %v656_v26, %v649_v4  ;;  %vm2009_vm15 = vnez %v1937_v18  ;;  %v532_v18 = vpop.f32.mrf.mxu3 }
 0x31b   :  { %990 = vmatpush.msk.msrb.mxu2 %vm1997_vm10, %v658_v15  ;;  %999 = vmatpush.msk.msrb.mxu3 %vm1998_vm5, %v659_v0  ;;  %vm2010_vm10 = vmmov %vm1999_vm2 }
 0x31c   :  { %v643_v29 = vsel %vm2010_vm10, %v628_v48, %v631_v46  ;;  %vm2011_vm5 = vmmov %vm1999_vm2 }
 0x31d   :  { %v636_v6 = vsel %vm2011_vm5, %v631_v46, %v1700_v56 }
 0x321   :  { %v635_v25 = vpop.permute.xlu1 %634 }
 0x322   :  { %v637_v2 = vsel %vm1999_vm2, %v1700_v56, %v635_v25  ;;  %v638_v47 = vsel %vm2000_vm7, %v635_v25, %v628_v48  ;;  %vm2012_vm2 = vmmov %vm2001_vm8  ;;  %vm2014_vm8 = vnez %v1952_v39 }
 0x323   :  { %991 = vmatpush.msk.msrb.mxu2 %vm1435_vm1, %v637_v2  ;;  %1000 = vmatpush.msk.msrb.mxu3 %vm1439_vm6, %v638_v47  ;;  %vm2005_vm1 = vmmov %vm2002_vm0 }
 0x324   :  { %vm2006_vm6 = vmmov %vm1995_vm9  ;;  %vm2008_vm9 = vnez %v1934_v17 }
 0x325   :  { %1001 = vmatpush.msk.msrb.mxu3 %vm1542_vm12, %v617_v3  ;;  %vm2007_vm12 = vmmov %vm2006_vm6 }
 0x326   :  { %1002 = vmatmul.msk.f32.vlgmr.msrb.gmra.mxu3 %vm2002_vm0, %v774_v49  ;;  %vm2013_vm7 = vmmov %vm2012_vm2 }
 0x329   :  { %v612_v19 = vpop.permute.xlu1 %611 }
 0x32a   :  { %v616_v20 = vsel %vm2003_vm14, %v612_v19, %v614_v11  ;;  %vm2015_vm14 = vmmov %vm2002_vm0 }
 0x32b   :  { %992 = vmatpush.msk.msrb.mxu2 %vm2004_vm11, %v616_v20 }
 0x32c   :  { %993 = vmatmul.msk.f32.vlgmr.msrb.gmra.mxu2 %vm2005_vm1, %v774_v49 }
 0x331   :  { %v652_v1 = vpop.permute.xlu1 %651 }
 0x332   :  { %v664_v28 = vsel %vm2006_vm6, %v649_v4, %v652_v1  ;;  %v657_v23 = vsel %vm2007_vm12, %v652_v1, %v1695_v40 }
 0x333   :  { %972 = vmatpush.msk.msrb.mxu0 %vm2008_vm9, %v664_v28  ;;  %981 = vmatpush.msk.msrb.mxu1 %vm2009_vm15, %v657_v23 }
 0x335   :  { %973 = vmatpush.msk.msrb.mxu0 %vm1506_vm13, %v643_v29  ;;  %982 = vmatpush.msk.msrb.mxu1 %vm1510_vm3, %v636_v6 }
 0x339   :  { %v610_v16 = vpop.permute.xlu1 %609 }
 0x33a   :  { %v622_v32 = vsel %vm2012_vm2, %v604_v60, %v610_v16  ;;  %v615_v17 = vsel %vm2013_vm7, %v610_v16, %v612_v19 }
 0x33b   :  { %974 = vmatpush.msk.msrb.mxu0 %vm1556_vm4, %v622_v32  ;;  %983 = vmatpush.msk.msrb.mxu1 %vm2014_vm8, %v615_v17 }
 0x33c   :  { %975 = vmatmul.msk.f32.vlgmr.msrb.gmra.mxu0 %vm2002_vm0, %v774_v49  ;;  %984 = vmatmul.msk.f32.vlgmr.msrb.gmra.mxu1 %vm2015_vm14, %v774_v49 }
 0x341   :  { %v539_v61 = vpop.permute.xlu1 %538 }
 0x342   :  { %v541_v15 = vadd.f32 %v539_v61, %v463_v33  ;;  %v542_v0 = vadd.f32 %v539_v61, %v486_v13  ;;  %v543_v60 = vadd.f32 %v539_v61, %v509_v12  ;;  %v544_v48 = vadd.f32 %v539_v61, %v532_v18 }
 0x3a9   :  { %v855_v14 = vpop.f32.mrf.mxu3 }
 0x3aa   :  { %v868_v39 = vmul.f32 %v855_v14, %v855_v14 }
 0x3af   :  { %v835_v36 = vpop.f32.mrf.mxu2 }
 0x3b0   :  { %v867_v50 = vmul.f32 %v835_v36, %v835_v36 }
 0x3b9   :  { %v795_v37 = vpop.f32.mrf.mxu0  ;;  %v815_v27 = vpop.f32.mrf.mxu1 }
 0x3ba   :  { %v865_v62 = vmul.f32 %v795_v37, %v795_v37  ;;  %v860_v43 = vadd.f32 %v815_v27, %v795_v37  ;;  %v866_v53 = vmul.f32 %v815_v27, %v815_v27 }
 0x3bc   :  { %v869_v35 = vadd.f32 %v866_v53, %v865_v62  ;;  %v861_v34 = vadd.f32 %v860_v43, %v835_v36 }
 0x3be   :  { %v862_v42 = vadd.f32 %v861_v34, %v855_v14  ;;  %v870_v54 = vadd.f32 %v869_v35, %v867_v50 }
 0x3c0   :  { %863 = vadd.xlane.f32.xlu2 %v862_v42  ;;  %v871_v38 = vadd.f32 %v870_v54, %v868_v39 }
 0x3c2   :  { %872 = vadd.xlane.f32.xlu0 %v871_v38 }
 0x433   :  { %v864_v30 = vpop.xlane.xlu2 %863 }
 0x434   :  { %v874_v55 = vmul.f32 0.001953125, %v864_v30 }
 0x435   :  { %v873_v40 = vpop.xlane.xlu0 %872 }
 0x436   :  { %v876_v22 = vmul.f32 %v874_v55, %v874_v55  ;;  %v875_v31 = vmul.f32 0.001953125, %v873_v40 }
 0x438   :  { %v877_v56 = vsub.f32 %v875_v31, %v876_v22 }
 0x43a   :  { %v878_v58 = vmax.f32 %v877_v56, 0.0 }
 0x43c   :  { %v879_v59 = vadd.f32 1e-05, %v878_v58 }
 0x43e   :  { %1016 = vrsqrt.f32 %v879_v59  ;;  %vm886_vm3 = vweird.f32 %v879_v59 }
 0x444   :  { %v1017_v63 = vpop.eup %1016 }
 0x445   :  { %v881_v24 = vmul.f32 %v1017_v63, %v879_v59  ;;  %vm887_vm13 = vweird.f32 %v1017_v63 }
 0x446   :  { %vm888_vm4 = vmor %vm886_vm3, %vm887_vm13 }
 0x447   :  { %v882_v44 = vmul.f32 %v1017_v63, %v881_v24 }
 0x449   :  { %v883_v52 = vmul.f32 0.5, %v882_v44 }
 0x44b   :  { %v884_v7 = vsub.f32 1.5, %v883_v52 }
 0x44d   :  { %v885_v10 = vmul.f32 %v1017_v63, %v884_v7 }
 0x44f   :  { %v889_v21 = vsel %vm888_vm4, %v1017_v63, %v885_v10 }
 0x450   :  { %v890_v41 = vmul.f32 %v889_v21, %v858_v5 }
 0x452   :  { %895 = vperm.xlu1 %1012, %v890_v41   ;;  %v891_v8 = vmul.f32 %v890_v41, %v874_v55 }
 0x454   :  { %v892_v4 = vsub.f32 %v859_v57, %v891_v8 }
 0x45a   :  { %904 = vperm.xlu1 %1012, %v892_v4  }
 0x4c4   :  { %v896_v9 = vpop.permute.xlu1 %895 }
 0x4c5   :  { %v898_v45 = vmul.f32 %v896_v9, %v795_v37  ;;  %v899_v51 = vmul.f32 %v896_v9, %v815_v27  ;;  %v900_v11 = vmul.f32 %v896_v9, %v835_v36  ;;  %v901_v26 = vmul.f32 %v896_v9, %v855_v14 }
 0x4cc   :  { %v905_v25 = vpop.permute.xlu1 %904 }
 0x4cd   :  { %v907_v2 = vadd.f32 %v905_v25, %v898_v45  ;;  %v908_v47 = vadd.f32 %v905_v25, %v899_v51  ;;  %v909_v3 = vadd.f32 %v905_v25, %v900_v11  ;;  %v910_v49 = vadd.f32 %v905_v25, %v901_v26 }
 0x4cf   :  { %v911_v19 = vadd.f32 %v907_v2, %v541_v15  ;;  %v912_v20 = vadd.f32 %v908_v47, %v542_v0  ;;  %v913_v46 = vadd.f32 %v909_v3, %v543_v60  ;;  %v914_v1 = vadd.f32 %v910_v49, %v544_v48 }
 0x4d1   :  { %v915_v28 = vmax.f32 %v911_v19, 0.0  ;;  %v916_v23 = vmax.f32 %v912_v20, 0.0  ;;  %v917_v29 = vmax.f32 %v913_v46, 0.0  ;;  %v918_v6 = vmax.f32 %v914_v1, 0.0 }
 0x4d3   :  { %919 = vst [vmem:[%s1811_s8] sm:$0xff] %v915_v28 }
 0x4d4   :  { %920 = vst [vmem:[%s1811_s8 + $0x8] sm:$0xff] %v916_v23 }
 0x4d5   :  { %921 = vst [vmem:[%s1811_s8 + $0x10] sm:$0xff] %v917_v29 }
 0x4d6   :  { %922 = vst [vmem:[%s1811_s8 + $0x18] sm:$0xff] %v918_v6 }

</bundles_post_ra>
